<compile_context>
chip_gen: v7x
topology: tpu7x:2x2x1
jax: 0.10.0
libtpu: 0.0.40
codegen_flags: <defaults>
</compile_context>

<pallas_src>
import functools
import math

import jax
import jax.numpy as jnp
from jax.experimental import pallas as pl
from jax.experimental.pallas import tpu as pltpu


_VMEM_LIMIT_BYTES = 64 * 1024 * 1024      # <= v7x physical; well under v5e/v6e.
_DEFAULT_VMEM_BUDGET = 24 * 1024 * 1024   # in+out blocks, double-buffered.
_TARGET_STEP_BYTES = 2 * 1024 * 1024      # ~85%+ of HBM roofline per step.


def _largest_divisor_leq(n, cap):
    cap = max(1, min(n, cap))
    for d in range(cap, 0, -1):
        if n % d == 0:
            return d
    return 1


def _spatial_tile(hw, max_elems):
    """Largest lane-aligned (multiple-of-128) divisor of hw that is <= max_elems."""
    if hw <= max_elems:
        return hw
    d = (max_elems // 128) * 128
    while d >= 128:
        if hw % d == 0:
            return d
        d -= 128
    # TODO(synk): masked ragged spatial tiles for HW not divisible by 128; until
    # then fall back to a whole-row block (may exceed the requested budget).
    return hw


# -----------------------------------------------------------------------------
# Single-pass fused kernel (whole (C, HW) slab(s) resident in VMEM).
#   channels_on_lanes=False:  x_ref/o_ref are (Bt, C, HW)   (HW on lanes)
#   channels_on_lanes=True:   x_ref/o_ref are (Bt, HW, C)   (C  on lanes)
#   w1: (Ch, C) torch fc1.weight, b1: (1, Ch), w2: (C, Ch) torch fc2.weight,
#   b2: (1, C).
# -----------------------------------------------------------------------------
def _se_fused_kernel(x_ref, w1_ref, b1_ref, w2_ref, b2_ref, o_ref, *,
                     channels_on_lanes):
    x = x_ref[...].astype(jnp.float32)
    pool_axis = 1 if channels_on_lanes else 2
    pooled = jnp.mean(x, axis=pool_axis)                          # (Bt, C)

    # fc1 + ReLU: h = relu(pooled @ W1.T + b1)  (broadcast-mul + lane reduce)
    h = jnp.sum(pooled[:, None, :] * w1_ref[...][None, :, :], axis=-1)
    h = jnp.maximum(h + b1_ref[...], 0.0)                         # (Bt, Ch)

    # fc2 + sigmoid: g = sigmoid(h @ W2.T + b2)
    g = jnp.sum(h[:, None, :] * w2_ref[...][None, :, :], axis=-1)
    g = g + b2_ref[...]                                           # (Bt, C)
    g = pl.reciprocal(1.0 + jnp.exp(-g), approx=False)            # EUP exp+rcp

    scale = g[:, None, :] if channels_on_lanes else g[:, :, None]
    o_ref[...] = (x * scale).astype(o_ref.dtype)


# -----------------------------------------------------------------------------
# Two-pass fallback for slabs too large to keep resident (spatial tiling).
# Pass 1: accumulate per-channel spatial sums into a (1, C, 1) output block.
# -----------------------------------------------------------------------------
def _se_pool_kernel(x_ref, s_ref):
    @pl.when(pl.program_id(1) == 0)
    def _init():
        s_ref[...] = jnp.zeros_like(s_ref)
    s_ref[...] += jnp.sum(x_ref[...].astype(jnp.float32), axis=-1, keepdims=True)


# Pass 2: recompute the tiny gate once per batch element (t == 0), keep it in a
# VMEM scratch across all spatial tiles of that batch element, and scale.
def _se_scale_kernel(pooled_ref, w1t_ref, b1_ref, w2_ref, b2_ref, x_ref, o_ref,
                     gate_ref, *, inv_hw):
    @pl.when(pl.program_id(1) == 0)
    def _gate():
        p = pooled_ref[0] * inv_hw                                # (C, 1)
        h = jnp.sum(p * w1t_ref[...], axis=0, keepdims=True)      # (1, Ch)
        h = jnp.maximum(h + b1_ref[...], 0.0)
        g = jnp.sum(h * w2_ref[...], axis=1, keepdims=True)       # (C, 1)
        g = g + b2_ref[...]
        gate_ref[...] = pl.reciprocal(1.0 + jnp.exp(-g), approx=False)

    x = x_ref[...].astype(jnp.float32)                            # (1, C, Thw)
    o_ref[...] = (x * gate_ref[...]).astype(o_ref.dtype)


# -----------------------------------------------------------------------------
# Wrapper
# -----------------------------------------------------------------------------
def se_block(x, params, *, vmem_budget_bytes=_DEFAULT_VMEM_BUDGET):
    """SEBlock forward.

    x:      (B, C, H, W), NCHW (PyTorch convention); f32 or bf16.
    params: torch-layout tensors: fc1_w (Ch, C), fc1_b (Ch,),
            fc2_w (C, Ch), fc2_b (C,).
    """
    B, C, H, W = x.shape
    Ch = params["fc1_w"].shape[0]
    HW = H * W
    itemsize = jnp.dtype(x.dtype).itemsize
    slab_bytes = C * HW * itemsize

    w1 = params["fc1_w"].astype(jnp.float32)                      # (Ch, C)
    b1 = params["fc1_b"].reshape(1, Ch).astype(jnp.float32)
    w2 = params["fc2_w"].astype(jnp.float32)                      # (C, Ch)
    b2 = params["fc2_b"].astype(jnp.float32)

    fused_ok = 4 * slab_bytes <= vmem_budget_bytes   # in+out, double-buffered
    if fused_ok:
        channels_on_lanes = HW < 128                 # lane-dense layout choice
        if channels_on_lanes:
            x2 = jnp.transpose(x.reshape(B, C, HW), (0, 2, 1))    # (B, HW, C)
        else:
            x2 = x.reshape(B, C, HW)                              # (B, C, HW)

        bt_cap = min(max(1, _TARGET_STEP_BYTES // slab_bytes),
                     max(1, vmem_budget_bytes // (4 * slab_bytes)))
        if B >= 2:
            bt_cap = min(bt_cap, B // 2)   # keep >= 2 grid steps for v7x cores
        Bt = _largest_divisor_leq(B, bt_cap)
        block = (Bt, HW, C) if channels_on_lanes else (Bt, C, HW)
        grid = (B // Bt,)

        cost = pl.CostEstimate(
            flops=2 * B * C * HW + 4 * B * C * Ch,
            transcendentals=B * C,
            bytes_accessed=2 * B * C * HW * itemsize + 2 * C * Ch * 4)

        out = pl.pallas_call(
            functools.partial(_se_fused_kernel,
                              channels_on_lanes=channels_on_lanes),
            out_shape=jax.ShapeDtypeStruct(x2.shape, x.dtype),
            grid_spec=pltpu.PrefetchScalarGridSpec(
                num_scalar_prefetch=0,
                grid=grid,
                in_specs=[
                    pl.BlockSpec(block, lambda b: (b, 0, 0)),
                    # Tiny weights/biases: constant block index -> resident
                    # in VMEM across the whole grid (no re-DMA).
                    pl.BlockSpec((Ch, C), lambda b: (0, 0)),
                    pl.BlockSpec((1, Ch), lambda b: (0, 0)),
                    pl.BlockSpec((C, Ch), lambda b: (0, 0)),
                    pl.BlockSpec((1, C), lambda b: (0, 0)),
                ],
                out_specs=pl.BlockSpec(block, lambda b: (b, 0, 0)),
            ),
            compiler_params=pltpu.CompilerParams(
                dimension_semantics=("parallel",),
                vmem_limit_bytes=_VMEM_LIMIT_BYTES),
            cost_estimate=cost,
        )(x2, w1, b1, w2, b2.reshape(1, C))

        if channels_on_lanes:
            out = jnp.transpose(out, (0, 2, 1))
        return out.reshape(B, C, H, W)

    # ---- two-pass spatially-tiled fallback (slab exceeds the VMEM budget) ----
    x2 = x.reshape(B, C, HW)
    tile_limit = min(vmem_budget_bytes // 4, _TARGET_STEP_BYTES)
    thw = _spatial_tile(HW, max(128, tile_limit // (C * itemsize)))
    n_t = HW // thw

    # Pass 1: per-channel spatial sums (accumulated in the resident out block).
    pooled = pl.pallas_call(
        _se_pool_kernel,
        out_shape=jax.ShapeDtypeStruct((B, C, 1), jnp.float32),
        grid_spec=pltpu.PrefetchScalarGridSpec(
            num_scalar_prefetch=0,
            grid=(B, n_t),
            in_specs=[pl.BlockSpec((1, C, thw), lambda b, t: (b, 0, t))],
            out_specs=pl.BlockSpec((1, C, 1), lambda b, t: (b, 0, 0)),
        ),
        compiler_params=pltpu.CompilerParams(
            dimension_semantics=("parallel", "arbitrary"),
            vmem_limit_bytes=_VMEM_LIMIT_BYTES),
        cost_estimate=pl.CostEstimate(
            flops=B * C * HW, transcendentals=0,
            bytes_accessed=B * C * HW * itemsize),
    )(x2)

    # Pass 2: gate (computed once per batch element, kept in VMEM scratch) and
    # per-channel scaling of each spatial tile.
    out = pl.pallas_call(
        functools.partial(_se_scale_kernel, inv_hw=1.0 / HW),
        out_shape=jax.ShapeDtypeStruct((B, C, HW), x.dtype),
        grid_spec=pltpu.PrefetchScalarGridSpec(
            num_scalar_prefetch=0,
            grid=(B, n_t),
            in_specs=[
                pl.BlockSpec((1, C, 1), lambda b, t: (b, 0, 0)),
                pl.BlockSpec((C, Ch), lambda b, t: (0, 0)),      # W1.T
                pl.BlockSpec((1, Ch), lambda b, t: (0, 0)),
                pl.BlockSpec((C, Ch), lambda b, t: (0, 0)),      # W2
                pl.BlockSpec((C, 1), lambda b, t: (0, 0)),
                pl.BlockSpec((1, C, thw), lambda b, t: (b, 0, t)),
            ],
            out_specs=pl.BlockSpec((1, C, thw), lambda b, t: (b, 0, t)),
            scratch_shapes=[pltpu.VMEM((C, 1), jnp.float32)],
        ),
        compiler_params=pltpu.CompilerParams(
            dimension_semantics=("parallel", "arbitrary"),
            vmem_limit_bytes=_VMEM_LIMIT_BYTES),
        cost_estimate=pl.CostEstimate(
            flops=B * C * HW + 4 * B * C * Ch, transcendentals=B * C,
            bytes_accessed=2 * B * C * HW * itemsize),
    )(pooled, jnp.transpose(w1), b1, w2, b2.reshape(C, 1), x2)
    return out.reshape(B, C, H, W)


# -----------------------------------------------------------------------------
# Pure-JAX reference (mirrors the PyTorch SEBlock.forward exactly).
# -----------------------------------------------------------------------------
def se_block_ref(x, params):
    y = jnp.mean(x, axis=(2, 3))                                  # (B, C)
    h = jnp.maximum(y @ params["fc1_w"].T + params["fc1_b"], 0.0)
    g = 1.0 / (1.0 + jnp.exp(-(h @ params["fc2_w"].T + params["fc2_b"])))
    return x * g[:, :, None, None]


def make_params(key, channels, reduction=16):
    ch = channels // reduction
    k1, k2, k3, k4 = jax.random.split(key, 4)
    s1 = 1.0 / math.sqrt(channels)
    s2 = 1.0 / math.sqrt(ch)
    return {
        "fc1_w": jax.random.normal(k1, (ch, channels), jnp.float32) * s1,
        "fc1_b": jax.random.normal(k2, (ch,), jnp.float32) * s1,
        "fc2_w": jax.random.normal(k3, (channels, ch), jnp.float32) * s2,
        "fc2_b": jax.random.normal(k4, (channels,), jnp.float32) * s2,
    }


# -----------------------------------------------------------------------------
if __name__ == "__main__":
    key = jax.random.PRNGKey(0)
    kx, kp = jax.random.split(key)

    # Config 1: B=2, C=64, 16x16 spatial (HW=256 -> spatial on lanes).
    B, C, H, W = 2, 64, 16, 16
    x = jax.random.normal(kx, (B, C, H, W), jnp.float32)
    params = make_params(kp, C, reduction=16)

    se = jax.jit(se_block)
    out = jax.block_until_ready(se(x, params))
    ref = se_block_ref(x, params)
    assert out.shape == (B, C, H, W), out.shape
    assert bool(jnp.all(jnp.isfinite(out)))
    err = float(jnp.max(jnp.abs(out - ref)))
    assert err < 1e-4, f"fused (HW-on-lanes) mismatch: {err}"

    # Config 2: deep stage, B=2, C=512, 2x2 spatial (HW=4 -> channels on lanes).
    B2, C2, H2, W2 = 2, 512, 2, 2
    x2 = jax.random.normal(jax.random.fold_in(key, 7), (B2, C2, H2, W2),
                           jnp.float32)
    p2 = make_params(jax.random.fold_in(key, 8), C2, reduction=16)
    out2 = jax.block_until_ready(se(x2, p2))
    ref2 = se_block_ref(x2, p2)
    err2 = float(jnp.max(jnp.abs(out2 - ref2)))
    assert err2 < 1e-4, f"fused (C-on-lanes) mismatch: {err2}"

    # Config 3: forced two-pass spatially-tiled fallback (tiny VMEM budget so
    # the 64 KiB slab "exceeds" it; HW=256 splits into two lane-aligned tiles).
    se_tiled = jax.jit(functools.partial(se_block, vmem_budget_bytes=128 * 1024))
    out3 = jax.block_until_ready(se_tiled(x, params))
    err3 = float(jnp.max(jnp.abs(out3 - ref)))
    assert err3 < 1e-4, f"two-pass fallback mismatch: {err3}"

    # Config 4: bf16 activation I/O (halves HBM traffic; math stays f32).
    x_bf = x.astype(jnp.bfloat16)
    out4 = jax.block_until_ready(se(x_bf, params)).astype(jnp.float32)
    ref4 = se_block_ref(x_bf.astype(jnp.float32), params)
    err4 = float(jnp.max(jnp.abs(out4 - ref4)))
    assert err4 < 5e-2, f"bf16 path mismatch: {err4}"

    print("KERNEL_OK")
</pallas_src>

<mosaic_0001>
module attributes {stable_mosaic.version = 11 : i64} {
  func.func @_se_fused_kernel(%arg0: i32, %arg1: memref<1x64x256xf32, #tpu.memory_space<vmem>>, %arg2: memref<4x64xf32, #tpu.memory_space<vmem>>, %arg3: memref<1x4xf32, #tpu.memory_space<vmem>>, %arg4: memref<64x4xf32, #tpu.memory_space<vmem>>, %arg5: memref<1x64xf32, #tpu.memory_space<vmem>>, %arg6: memref<1x64x256xf32, #tpu.memory_space<vmem>>) attributes {dimension_semantics = [#tpu.dimension_semantics<parallel>], iteration_bounds = array<i64: 2>, scalar_prefetch = 0 : i64, scratch_operands = 0 : i64, tpu.core_type = #tpu.core_type<tc>, window_params = [{transform_indices = @transform_0, window_bounds = array<i64: 1, 64, 256>}, {pipeline_mode = #tpu.pipeline_mode<synchronous>, transform_indices = @transform_1, window_bounds = array<i64: 4, 64>}, {pipeline_mode = #tpu.pipeline_mode<synchronous>, transform_indices = @transform_2, window_bounds = array<i64: 1, 4>}, {pipeline_mode = #tpu.pipeline_mode<synchronous>, transform_indices = @transform_3, window_bounds = array<i64: 64, 4>}, {pipeline_mode = #tpu.pipeline_mode<synchronous>, transform_indices = @transform_4, window_bounds = array<i64: 1, 64>}, {transform_indices = @transform_5, window_bounds = array<i64: 1, 64, 256>}]} {
    %c0 = arith.constant 0 : index
    %c0_0 = arith.constant 0 : index
    %c0_1 = arith.constant 0 : index
    %0 = vector.load %arg1[%c0, %c0_0, %c0_1] : memref<1x64x256xf32, #tpu.memory_space<vmem>>, vector<1x64x256xf32>
    %cst = arith.constant dense<0.000000e+00> : vector<1x64xf32>
    %1 = vector.multi_reduction <add>, %0, %cst [2] : vector<1x64x256xf32> to vector<1x64xf32>
    %cst_2 = arith.constant 2.560000e+02 : f32
    %2 = vector.broadcast %cst_2 : f32 to vector<1x64xf32>
    %3 = arith.divf %1, %2 : vector<1x64xf32>
    %4 = vector.shape_cast %3 : vector<1x64xf32> to vector<1x1x64xf32>
    %c0_3 = arith.constant 0 : index
    %c0_4 = arith.constant 0 : index
    %5 = vector.load %arg2[%c0_3, %c0_4] : memref<4x64xf32, #tpu.memory_space<vmem>>, vector<4x64xf32>
    %6 = vector.shape_cast %5 : vector<4x64xf32> to vector<1x4x64xf32>
    %7 = vector.broadcast %4 : vector<1x1x64xf32> to vector<1x4x64xf32>
    %8 = arith.mulf %7, %6 : vector<1x4x64xf32>
    %cst_5 = arith.constant dense<0.000000e+00> : vector<1x4xf32>
    %9 = vector.multi_reduction <add>, %8, %cst_5 [2] : vector<1x4x64xf32> to vector<1x4xf32>
    %c0_6 = arith.constant 0 : index
    %c0_7 = arith.constant 0 : index
    %10 = vector.load %arg3[%c0_6, %c0_7] : memref<1x4xf32, #tpu.memory_space<vmem>>, vector<1x4xf32>
    %11 = arith.addf %9, %10 : vector<1x4xf32>
    %cst_8 = arith.constant 0.000000e+00 : f32
    %12 = vector.broadcast %cst_8 : f32 to vector<1x4xf32>
    %13 = arith.maximumf %11, %12 : vector<1x4xf32>
    %14 = vector.shape_cast %13 : vector<1x4xf32> to vector<1x1x4xf32>
    %c0_9 = arith.constant 0 : index
    %c0_10 = arith.constant 0 : index
    %15 = vector.load %arg4[%c0_9, %c0_10] : memref<64x4xf32, #tpu.memory_space<vmem>>, vector<64x4xf32>
    %16 = vector.shape_cast %15 : vector<64x4xf32> to vector<1x64x4xf32>
    %17 = vector.broadcast %14 : vector<1x1x4xf32> to vector<1x64x4xf32>
    %18 = arith.mulf %17, %16 : vector<1x64x4xf32>
    %cst_11 = arith.constant dense<0.000000e+00> : vector<1x64xf32>
    %19 = vector.multi_reduction <add>, %18, %cst_11 [2] : vector<1x64x4xf32> to vector<1x64xf32>
    %c0_12 = arith.constant 0 : index
    %c0_13 = arith.constant 0 : index
    %20 = vector.load %arg5[%c0_12, %c0_13] : memref<1x64xf32, #tpu.memory_space<vmem>>, vector<1x64xf32>
    %21 = arith.addf %19, %20 : vector<1x64xf32>
    %cst_14 = arith.constant 0.000000e+00 : f32
    %22 = vector.broadcast %cst_14 : f32 to vector<1x64xf32>
    %23 = arith.subf %22, %21 : vector<1x64xf32>
    %24 = math.exp %23 : vector<1x64xf32>
    %cst_15 = arith.constant 1.000000e+00 : f32
    %25 = vector.broadcast %cst_15 : f32 to vector<1x64xf32>
    %26 = arith.addf %25, %24 : vector<1x64xf32>
    %27 = tpu.reciprocal %26 : vector<1x64xf32> -> vector<1x64xf32>
    %28 = vector.shape_cast %27 : vector<1x64xf32> to vector<1x64x1xf32>
    %29 = vector.broadcast %28 : vector<1x64x1xf32> to vector<1x64x256xf32>
    %30 = arith.mulf %0, %29 : vector<1x64x256xf32>
    %c0_16 = arith.constant 0 : index
    %c0_17 = arith.constant 0 : index
    %c0_18 = arith.constant 0 : index
    %31 = vector.load %arg6[%c0_16, %c0_17, %c0_18] : memref<1x64x256xf32, #tpu.memory_space<vmem>>, vector<1x64x256xf32>
    tpu.vector_store %arg6[%c0_16, %c0_17, %c0_18], %30 {strides = array<i32>} : memref<1x64x256xf32, #tpu.memory_space<vmem>>, vector<1x64x256xf32>,
    return
  }
  func.func @transform_0(%arg0: i32) -> (i32, i32, i32) {
    %c0_i32 = arith.constant 0 : i32
    %c0_i32_0 = arith.constant 0 : i32
    %c0_i32_1 = arith.constant 0 : i32
    return %arg0, %c0_i32, %c0_i32_0 : i32, i32, i32
  }
  func.func @transform_1(%arg0: i32) -> (i32, i32) {
    %c0_i32 = arith.constant 0 : i32
    %c0_i32_0 = arith.constant 0 : i32
    %c0_i32_1 = arith.constant 0 : i32
    return %c0_i32, %c0_i32_0 : i32, i32
  }
  func.func @transform_2(%arg0: i32) -> (i32, i32) {
    %c0_i32 = arith.constant 0 : i32
    %c0_i32_0 = arith.constant 0 : i32
    %c0_i32_1 = arith.constant 0 : i32
    return %c0_i32, %c0_i32_0 : i32, i32
  }
  func.func @transform_3(%arg0: i32) -> (i32, i32) {
    %c0_i32 = arith.constant 0 : i32
    %c0_i32_0 = arith.constant 0 : i32
    %c0_i32_1 = arith.constant 0 : i32
    return %c0_i32, %c0_i32_0 : i32, i32
  }
  func.func @transform_4(%arg0: i32) -> (i32, i32) {
    %c0_i32 = arith.constant 0 : i32
    %c0_i32_0 = arith.constant 0 : i32
    %c0_i32_1 = arith.constant 0 : i32
    return %c0_i32, %c0_i32_0 : i32, i32
  }
  func.func @transform_5(%arg0: i32) -> (i32, i32, i32) {
    %c0_i32 = arith.constant 0 : i32
    %c0_i32_0 = arith.constant 0 : i32
    %c0_i32_1 = arith.constant 0 : i32
    return %arg0, %c0_i32, %c0_i32_0 : i32, i32, i32
  }
}

</mosaic_0001>

<bundles_post_ra>
// kernel: se_block.1
= control target key start
LH: loop header
LB: loop body
LE: loop exit
PB: predicated region body
PF: predicated region fallthrough
CT: control target
= control target key end

     0   :  { %10 = vsyncpa [#allocation3], 0  ;;  %s3796_s0 = inlined_call_operand.hbm [shape: f32[2,64,256], index: 0, kind: input, shape index: {}]   ;;  %s3797_s1 = inlined_call_operand.hbm [shape: f32[4,64], index: 1, kind: input, shape index: {}]   ;;  %s3798_s2 = inlined_call_operand.hbm [shape: f32[1,4], index: 2, kind: input, shape index: {}]   ;;  %s3799_s3 = inlined_call_operand.hbm [shape: f32[64,4], index: 3, kind: input, shape index: {}]   ;;  %s3800_s4 = inlined_call_operand.hbm [shape: f32[1,64], index: 4, kind: input, shape index: {}]   ;;  %s3801_s5 = inlined_call_operand.hbm [shape: f32[2,64,256], index: 5, kind: output, shape index: {}]  }
   0x1   :  { %12 = vsyncpa [#allocation3 + $0x1], 0 }
   0x2   :  { %13 = vsyncpa [#allocation6], 0 }
   0x3   :  { %14 = vsyncpa [#allocation9], 0 }
   0x4   :  { %15 = vsyncpa [#allocation4], 0 }
   0x5   :  { %17 = vsyncpa [#allocation4 + $0x1], 0  ;;  %s2791_s18 = smov 0   ;;  %s2793_s19 = smov 0  }
   0x6   :  { %s2795_s20 = smov 0   ;;  %s2797_s21 = smov 0  }
   0x7 LB: > { %s2812_s22 = sadd.s32 4294967295, %s2746_s21   ;;  %s2360_s23 = sadd.s32 4294967294, %s2746_s21   ;;  %s2746_s21 = sphi %s2797_s21, %s3824_s21   ;;  %s2742_s20 = sphi %s2795_s20, %s3823_s20   ;;  %s2738_s19 = sphi %s2793_s19, %s3822_s19   ;;  %s2734_s18 = sphi %s2791_s18, %s3821_s18  }
   0x8   : > { %p43_p0 = scmp.ne.s32.totalorder %s2738_s19, %s2734_s18  ;;  %p3802_p1 = scmp.eq.s32.totalorder %s2812_s22, 0 }
   0x9   : > { %p157_p3 = scmp.eq.s32.totalorder %s2360_s23, 1  ;;  %p2361_p5 = scmp.ge.s32.totalorder %s2746_s21, 1 }
   0xa   : > { %p2821_p4 = por %p3802_p1, %p43_p0  ;;  %p164_p7 = scmp.lt.s32.totalorder %s2746_s21, 3 }
   0xb   : > { %p2826_p6 = por %p157_p3, %p43_p0  ;;  %s2748_s27 = smov [#allocation5]  }
   0xc   : > { %s3805_s24 = scalar_select %p2821_p4, 1, 0 }
   0xd   : > { %s3806_s25 = scalar_select %p2826_p6, 1, 0 }
   0xe   : > { %p2831_p8 = pnand %p2361_p5, %p164_p7  ;;  %s177_s28 = sshll.u32 %s2748_s27, 4  ;;  %s178_s28 = int_to_ptr.vmem [resolvable:$true] %s177_s28 }
   0xf   : > { %s2749_s29 = smov [#allocation8]   ;;  %s2750_s7 = smov [#allocation7]  }
  0x10   : > { %s3807_s26 = scalar_select %p2831_p8, 1, 0 }
  0x11   : > { %p2406_p10 = pneg %p2831_p8  ;;  %s198_s30 = sshll.u32 %s2749_s29, 4  ;;  %s2844_s30 = int_to_ptr.vmem [resolvable:$true] %s198_s30 }
  0x12   : > { %s2846_s8 = sshll.u32 %s2750_s7, 4  ;;  %s2530_s11 = scalar_lea.hbm %s3797_s1, 64  ;;  %s189_s8 = int_to_ptr.vmem [resolvable:$true] %s2846_s8 }
  0x13   : > { %p2840_p11 = pnand %p2406_p10, %p3802_p1  ;;  %p2531_p12 = scmp.ne.s32.totalorder %s3797_s1, %s2530_s11 }
  0x14   : > { %p2537_p5 = scmp.lt.u32.totalorder %s2530_s11, %s3797_s1 }
  0x15   : > { %p2856_p13 = pneg %p2840_p11 }
  0x17   : > { %p2533_p0 = pnand %p2856_p13, %p2531_p12 }
  0x19   : > { %p2534_p3 = pneg %p2533_p0 }
  0x1b   : > { %p2539_p7 = pnand %p2537_p5, %p2534_p3 }
  0x1d   : > { %2542 = shalt.err (!%p2539_p7)
}
  0x1e   : > { %s2543_s17 = scalar_lea.vmem %s178_s28, 64  ;;  %p2551_p2 = scmp.lt.s32.totalorder %s178_s28, %s178_s28 }
  0x1f   : > { %p2544_p10 = scmp.ne.s32.totalorder %s178_s28, %s2543_s17  ;;  %p2552_p6 = scmp.lt.s32.totalorder %s2543_s17, %s2543_s17 }
  0x21   : > { %p2546_p9 = pnand %p2544_p10, %p2856_p13  ;;  %p2553_p4 = por %p2552_p6, %p2551_p2 }
  0x23   : > { %p2547_p1 = pneg %p2546_p9 }
  0x25   : > { %p2554_p8 = pnand %p2553_p4, %p2547_p1 }
  0x27   : > { %2557 = shalt.err (!%p2554_p8)
}
  0x28   : > { %2409 = dma.hbm_to_vmem [thread:$0]  (!%p2840_p11), %s3797_s1, 64, %s178_s28, [#allocation6]  }
  0x29   : > { %s2558_s9 = scalar_lea.hbm %s3799_s3, 1024 }
  0x2a   : > { %p2559_p9 = scmp.ne.s32.totalorder %s3799_s3, %s2558_s9  ;;  %p2565_p1 = scmp.lt.u32.totalorder %s2558_s9, %s3799_s3 }
  0x2c   : > { %p2561_p12 = pnand %p2559_p9, %p2856_p13 }
  0x2e   : > { %p2562_p2 = pneg %p2561_p12 }
  0x30   : > { %p2567_p4 = pnand %p2565_p1, %p2562_p2 }
  0x32   : > { %2570 = shalt.err (!%p2567_p4)
}
  0x33   : > { %s2571_s28 = scalar_lea.vmem %s2844_s30, 1024  ;;  %p2579_p3 = scmp.lt.s32.totalorder %s2844_s30, %s2844_s30 }
  0x34   : > { %p2572_p6 = scmp.ne.s32.totalorder %s2844_s30, %s2571_s28  ;;  %p2580_p5 = scmp.lt.s32.totalorder %s2571_s28, %s2571_s28 }
  0x36   : > { %p2574_p8 = pnand %p2572_p6, %p2856_p13  ;;  %p2581_p7 = por %p2580_p5, %p2579_p3 }
  0x38   : > { %p2575_p0 = pneg %p2574_p8 }
  0x3a   : > { %p2582_p10 = pnand %p2581_p7, %p2575_p0 }
  0x3c   : > { %2585 = shalt.err (!%p2582_p10)
}
  0x3d   : > { %s2751_s15 = smov 128   ;;  %s2752_s16 = smov 8  }
  0x3e   : > { %2415 = dma.hbm_to_vmem [thread:$0]  (!%p2840_p11), %s3799_s3, 1024, %s2844_s30, [#allocation9], %s2751_s15, %s2751_s15, %s2752_s16  }
  0x3f   : > { %s2586_s7 = scalar_lea.hbm %s3798_s2, 16 }
  0x40   : > { %p2587_p9 = scmp.ne.s32.totalorder %s3798_s2, %s2586_s7  ;;  %p2593_p1 = scmp.lt.u32.totalorder %s2586_s7, %s3798_s2 }
  0x42   : > { %p2589_p12 = pnand %p2587_p9, %p2856_p13 }
  0x44   : > { %p2590_p2 = pneg %p2589_p12 }
  0x46   : > { %p2595_p4 = pnand %p2593_p1, %p2590_p2 }
  0x48   : > { %2598 = shalt.err (!%p2595_p4)
}
  0x49   : > { %s2599_s13 = scalar_lea.vmem %s189_s8, 16  ;;  %s2606_s30 = scalar_lea.vmem %s189_s8, 32 }
  0x4a   : > { %p2600_p6 = scmp.ne.s32.totalorder %s189_s8, %s2599_s13  ;;  %p2607_p3 = scmp.lt.s32.totalorder %s189_s8, %s189_s8 }
  0x4b   : > { %p2608_p5 = scmp.lt.s32.totalorder %s2606_s30, %s2599_s13 }
  0x4c   : > { %p2602_p8 = pnand %p2600_p6, %p2856_p13 }
  0x4d   : > { %p2609_p7 = por %p2608_p5, %p2607_p3 }
  0x4e   : > { %p2603_p0 = pneg %p2602_p8 }
  0x50   : > { %p2610_p10 = pnand %p2609_p7, %p2603_p0 }
  0x52   : > { %2613 = shalt.err (!%p2610_p10)
}
  0x53   : > { %2412 = dma.hbm_to_vmem [thread:$0]  (!%p2840_p11), %s3798_s2, 16, %s189_s8, [#allocation6]  }
  0x54   : > { %s2753_s16 = smov [#allocation10]   ;;  %s2614_s29 = scalar_lea.hbm %s3800_s4, 16 }
  0x55   : > { %s212_s17 = sshll.u32 %s2753_s16, 4  ;;  %p2615_p9 = scmp.ne.s32.totalorder %s3800_s4, %s2614_s29  ;;  %s213_s17 = int_to_ptr.vmem [resolvable:$true] %s212_s17 }
  0x56   : > { %p2621_p1 = scmp.lt.u32.totalorder %s2614_s29, %s3800_s4 }
  0x57   : > { %p2617_p12 = pnand %p2615_p9, %p2856_p13 }
  0x59   : > { %p2618_p2 = pneg %p2617_p12 }
  0x5b   : > { %p2623_p4 = pnand %p2621_p1, %p2618_p2 }
  0x5d   : > { %2626 = shalt.err (!%p2623_p4)
}
  0x5e   : > { %s2627_s8 = scalar_lea.vmem %s213_s17, 16  ;;  %s2634_s12 = scalar_lea.vmem %s213_s17, 32 }
  0x5f   : > { %p2628_p6 = scmp.ne.s32.totalorder %s213_s17, %s2627_s8  ;;  %p2635_p3 = scmp.lt.s32.totalorder %s213_s17, %s213_s17 }
  0x60   : > { %p2636_p5 = scmp.lt.s32.totalorder %s2634_s12, %s2627_s8 }
  0x61   : > { %p2630_p8 = pnand %p2628_p6, %p2856_p13 }
  0x62   : > { %p2637_p7 = por %p2636_p5, %p2635_p3 }
  0x63   : > { %p2631_p0 = pneg %p2630_p8 }
  0x65   : > { %p2638_p10 = pnand %p2637_p7, %p2631_p0 }
  0x67   : > { %2641 = shalt.err (!%p2638_p10)
}
  0x68   : > { %2418 = dma.hbm_to_vmem [thread:$0]  (!%p2840_p11), %s3800_s4, 16, %s213_s17, [#allocation9]  }
  0x69   : > { %s2933_s14 = sadd.s32 1, %s2746_s21   ;;  %s30_s28 = sadd.s32 1, %s2742_s20 }
  0x6a   : > { %s27_s6 = ssub.s32 %s2746_s21, %s2933_s14  ;;  %p37_p13 = scmp.ne.s32.totalorder %s2742_s20, %s2738_s19 }
  0x6b   : > { %p28_p9 = scmp.eq.s32.totalorder %s27_s6, 0  ;;  %p38_p12 = scmp.eq.s32.totalorder %s2746_s21, 0 }
  0x6c   : > { %p3810_p2 = scmp.eq.s32.totalorder %s2812_s22, 1  ;;  %p2431_p4 = scmp.lt.s32.totalorder %s2746_s21, 2 }
  0x6d   : > { %s2949_s16 = scalar_select %p28_p9, %s2742_s20, %s30_s28  }
  0x6e   : > { %p2943_p1 = por %p3810_p2, %p37_p13  ;;  %p39_p6 = por %p38_p12, %p37_p13 }
  0x6f   : > { %s223_s23 = sand.u32 1, %s2742_s20   ;;  %s2384_s17 = sshll.u32 %s2746_s21, 11 }
  0x70   : > { %s2367_s27 = sshll.u32 %s223_s23, 7  ;;  %s2956_s9 = scalar_lea.hbm %s3796_s0, %s2384_s17 }
  0x71   : > { %s227_s10 = scalar_lea.vmem [#allocation2], %s2367_s27  ;;  %p2960_p11 = pnand %p2431_p4, %p39_p6 }
  0x72   : > { %s234_s11 = sshll.u32 %s227_s10, 4  ;;  %s2964_s12 = scalar_lea.sflag [#allocation3], %s223_s23  ;;  %s2958_s11 = int_to_ptr.vmem [resolvable:$true] %s234_s11 }
  0x73   : > { %s2642_s13 = scalar_lea.hbm %s2956_s9, 2048  ;;  %p2644_p0 = pneg %p2960_p11 }
  0x74   : > { %p2643_p8 = scmp.ne.s32.totalorder %s2956_s9, %s2642_s13  ;;  %s2647_s6 = scalar_lea.hbm %s3796_s0, 4096 }
  0x75   : > { %p2648_p7 = scmp.lt.u32.totalorder %s2956_s9, %s3796_s0  ;;  %p2649_p10 = scmp.lt.u32.totalorder %s2647_s6, %s2642_s13 }
  0x76   : > { %p2645_p3 = pnand %p2644_p0, %p2643_p8  ;;  %p2651_p9 = scmp.lt.u32.totalorder %s2642_s13, %s2956_s9 }
  0x77   : > { %p2650_p13 = por %p2649_p10, %p2648_p7 }
  0x78   : > { %p2646_p5 = pneg %p2645_p3 }
  0x79   : > { %p2652_p12 = por %p2651_p9, %p2650_p13 }
  0x7b   : > { %p2653_p2 = pnand %p2652_p12, %p2646_p5 }
  0x7d   : > { %2656 = shalt.err (!%p2653_p2)
}
  0x7e   : > { %s2657_s23 = scalar_lea.vmem %s2958_s11, 2048  ;;  %s2754_s29 = smov [#allocation2]  }
  0x7f   : > { %p2658_p4 = scmp.ne.s32.totalorder %s2958_s11, %s2657_s23  ;;  %s2662_s7 = sshll.u32 %s2754_s29, 4  ;;  %s2663_s7 = int_to_ptr.vmem [resolvable:$false] %s2662_s7 }
  0x80   : > { %s2664_s10 = scalar_lea.vmem %s2663_s7, 4096  ;;  %p2665_p3 = scmp.lt.s32.totalorder %s2958_s11, %s2663_s7 }
  0x81   : > { %p2660_p6 = pnand %p2658_p4, %p2644_p0  ;;  %p2666_p7 = scmp.lt.s32.totalorder %s2664_s10, %s2657_s23 }
  0x83   : > { %p2661_p8 = pneg %p2660_p6  ;;  %p2667_p10 = por %p2666_p7, %p2665_p3 }
  0x85   : > { %p2668_p13 = pnand %p2667_p10, %p2661_p8 }
  0x87   : > { %2671 = shalt.err (!%p2668_p13)
}
  0x88   : > { %s2755_s13 = smov 256   ;;  %s2756_s30 = smov 16  }
  0x89   : > { %2422 = dma.hbm_to_vmem [thread:$0]  (!%p2960_p11), %s2956_s9, 2048, %s2958_s11, %s2964_s12, %s2755_s13, %s2755_s13, %s2756_s30  }
  0x8a   : > { %p3813_p0 = scmp.ne.s32.totalorder %s3807_s26, 0 }
  0x8b   : > { %s2995_s28 = sand.u32 (!%p3813_p0), 1, %s2738_s19   ;;  %p3814_p5 = scmp.ne.s32.totalorder (!%p3813_p0), %s3805_s24, 0 }
  0x8c   : > { %246 = sbr.rel (%p3813_p0) target bundleno = 1241 (0x4d9), region = 40  ;;  %s2371_s6 = sshll.u32 (!%p3813_p0), %s2995_s28, 7 }
  0x8d   : > { %s249_s27 = scalar_lea.sflag (!%p3813_p0), [#allocation3], %s2995_s28  ;;  %s3001_s17 = scalar_lea.vmem (!%p3813_p0), [#allocation2], %s2371_s6 }
  0x93   : > { %2717 = dma.done.wait (%p3814_p5), %s249_s27, 2048  }
  0x94   : > { %2719 = vsyncadd (%p3814_p5), %s249_s27, 4294965248  ;;  %p3815_p11 = scmp.eq.s32.totalorder %s2812_s22, 0 }
  0x96   : > { %2721 = dma.done.wait (%p3815_p11), [#allocation6], 80   ;;  %p3816_p9 = pmov %p3815_p11 }
  0x98   : > { %2723 = vsyncadd (%p3816_p9), [#allocation6], 4294967216  ;;  %p3817_p12 = pmov %p3816_p9 }
  0x99   : > { %p3818_p2 = pmov %p3816_p9 }
  0x9a   : > { %2725 = dma.done.wait (%p3817_p12), [#allocation9], 1040  }
  0x9b   : > { %2727 = vsyncadd (%p3818_p2), [#allocation9], 4294966256  ;;  %v299_v0 = vld [vmem:[%s3001_s17 + $0x20] sm:$0xff]  ;;  %v300_v1 = vld [vmem:[%s3001_s17 + $0x28] sm:$0xff]  ;;  %v346_v24 = vlaneseq  ;;  %v2757_v29 = vmov 0   ;;  %vm689_vm0 = vcmask 130112  }
  0x9c   : > { %v295_v2 = vld [vmem:[%s3001_s17] sm:$0xff]  ;;  %v317_v3 = vadd.f32 %v300_v1, %v299_v0  ;;  %v296_v4 = vld [vmem:[%s3001_s17 + $0x8] sm:$0xff]  ;;  %v301_v5 = vld [vmem:[%s3001_s17 + $0x30] sm:$0xff]  ;;  %2481 = vset.pattern.permute.xlu1 %v2757_v29  ;;  %2480 = vset.pattern.permute.xlu0 %v2757_v29  ;;  %vm696_vm1 = vcmask 195712   ;;  %vm703_vm2 = vcmask 261312   ;;  %vm710_vm3 = vcmask 326912  }
  0x9d   : > { %v302_v6 = vld [vmem:[%s3001_s17 + $0x38] sm:$0xff]  ;;  %v311_v7 = vadd.f32 %v296_v4, %v295_v2  ;;  %v297_v8 = vld [vmem:[%s3001_s17 + $0x10] sm:$0xff]  ;;  %v303_v14 = vld [vmem:[%s3001_s17 + $0x40] sm:$0xff]  ;;  %v3032_v25 = vshrl.u32 %v346_v24, 7  ;;  %vm717_vm4 = vcmask 392512   ;;  %vm724_vm5 = vcmask 458112  }
  0x9e   : > { %v298_v9 = vld [vmem:[%s3001_s17 + $0x18] sm:$0xff]  ;;  %318 = vadd.xlane.f32.xlu1 %v317_v3  ;;  %v320_v10 = vadd.f32 %v302_v6, %v301_v5  ;;  %v305_v12 = vld [vmem:[%s3001_s17 + $0x50] sm:$0xff]  ;;  %v304_v15 = vld [vmem:[%s3001_s17 + $0x48] sm:$0xff]  ;;  %vm731_vm6 = vcmask 523712   ;;  %vm850_vm7 = vcmask 1041409   ;;  %vm852_vm8 = vcmask 1042434  }
  0x9f   : > { %312 = vadd.xlane.f32.xlu0 %v311_v7  ;;  %v314_v11 = vadd.f32 %v298_v9, %v297_v8  ;;  %v306_v13 = vld [vmem:[%s3001_s17 + $0x58] sm:$0xff]  ;;  %v323_v17 = vadd.f32 %v304_v15, %v303_v14  ;;  %v309_v18 = vld [vmem:[%s3001_s17 + $0x70] sm:$0xff]  ;;  %v307_v20 = vld [vmem:[%s3001_s17 + $0x60] sm:$0xff]  ;;  %v3035_v26 = vsub.s32 0, %v3032_v25  ;;  %v3039_v30 = vsub.s32 1, %v3032_v25  ;;  %s3713_s24 = scalar_lea.vmem [#allocation11], %s2371_s6 }
  0xa0   : > { %v326_v16 = vadd.f32 %v306_v13, %v305_v12  ;;  %v310_v19 = vld [vmem:[%s3001_s17 + $0x78] sm:$0xff]  ;;  %v308_v21 = vld [vmem:[%s3001_s17 + $0x68] sm:$0xff]  ;;  %v344_v27 = vld [vmem:[#allocation5] sm:$0xf]  ;;  %v3043_v32 = vsub.s32 2, %v3032_v25  ;;  %v3047_v34 = vsub.s32 3, %v3032_v25 }
  0xa1   : > { %v332_v22 = vadd.f32 %v310_v19, %v309_v18  ;;  %v329_v23 = vadd.f32 %v308_v21, %v307_v20  ;;  %v349_v28 = vrot.slane %v344_v27, %v3035_v26  ;;  %v384_v31 = vrot.slane %v344_v27, %v3039_v30  ;;  %s2385_s26 = sshll.u32 %s2812_s22, 11  ;;  %s2249_s9 = sshll.u32 %s3713_s24, 4  ;;  %s3746_s9 = int_to_ptr.vmem [resolvable:$true] %s2249_s9 }
  0xa2   : > { %321 = vadd.xlane.f32.xlu1 %v320_v10  ;;  %v419_v33 = vrot.slane %v344_v27, %v3043_v32  ;;  %v454_v35 = vrot.slane %v344_v27, %v3047_v34  ;;  %vm854_vm9 = vcmask 1043459   ;;  %vm857_vm10 = vcmask 519168   ;;  %s3744_s12 = scalar_lea.hbm %s3801_s5, %s2385_s26  ;;  %s2236_s22 = scalar_lea.sflag [#allocation4], %s2995_s28 }
  0xa3   : > { %315 = vadd.xlane.f32.xlu0 %v314_v11  ;;  %vm1980_vm11 = vcmask 1044484   ;;  %vm1982_vm12 = vcmask 1045509   ;;  %vm1984_vm13 = vcmask 1046534   ;;  %vm1986_vm14 = vcmask 1047559   ;;  %s2672_s23 = scalar_lea.vmem %s3746_s9, 2048  ;;  %s2758_s29 = smov [#allocation11]  }
  0xa4   : > { %vm2045_vm15 = vcmask 31744   ;;  %p2673_p4 = scmp.ne.s32.totalorder %s3746_s9, %s2672_s23  ;;  %s2676_s7 = sshll.u32 %s2758_s29, 4  ;;  %s2677_s7 = int_to_ptr.vmem [resolvable:$false] %s2676_s7 }
  0xa5   : > { %s2678_s10 = scalar_lea.vmem %s2677_s7, 4096  ;;  %p2679_p3 = scmp.lt.s32.totalorder %s3746_s9, %s2677_s7 }
  0xa6   : > { %327 = vadd.xlane.f32.xlu1 %v326_v16  ;;  %p2674_p6 = pnand %p2673_p4, %p2943_p1  ;;  %p2680_p7 = scmp.lt.s32.totalorder %s2678_s10, %s2672_s23 }
  0xa7   : > { %324 = vadd.xlane.f32.xlu0 %v323_v17 }
  0xa8   : > { %p2675_p8 = pneg %p2674_p6  ;;  %p2681_p10 = por %p2680_p7, %p2679_p3 }
  0xaa   : > { %333 = vadd.xlane.f32.xlu1 %v332_v22  ;;  %p2682_p13 = pnand %p2681_p10, %p2675_p8 }
  0xab   : > { %330 = vadd.xlane.f32.xlu0 %v329_v23 }
  0xbb   : > { %355 = vbcast.lane.b32.xlu1 %v349_v28, 264 }
  0xbf   : > { %359 = vbcast.lane.b32.xlu1 %v349_v28, 272 }
  0xc1   : > { %351 = vbcast.lane.b32.xlu0 %v349_v28, 256 }
  0xc3   : > { %363 = vbcast.lane.b32.xlu1 %v349_v28, 280 }
  0xc5   : > { %367 = vbcast.lane.b32.xlu0 %v349_v28, 288 }
  0xc7   : > { %371 = vbcast.lane.b32.xlu1 %v349_v28, 296 }
  0xc9   : > { %375 = vbcast.lane.b32.xlu0 %v349_v28, 304 }
  0xcb   : > { %379 = vbcast.lane.b32.xlu1 %v349_v28, 312 }
  0xcd   : > { %386 = vbcast.lane.b32.xlu0 %v384_v31, 256 }
  0xcf   : > { %390 = vbcast.lane.b32.xlu1 %v384_v31, 264 }
  0xd1   : > { %394 = vbcast.lane.b32.xlu0 %v384_v31, 272 }
  0xd3   : > { %398 = vbcast.lane.b32.xlu1 %v384_v31, 280 }
  0xd5   : > { %402 = vbcast.lane.b32.xlu0 %v384_v31, 288 }
  0xd7   : > { %406 = vbcast.lane.b32.xlu1 %v384_v31, 296 }
  0xd9   : > { %410 = vbcast.lane.b32.xlu0 %v384_v31, 304 }
  0xdb   : > { %414 = vbcast.lane.b32.xlu1 %v384_v31, 312 }
  0xdd   : > { %421 = vbcast.lane.b32.xlu0 %v419_v33, 256 }
  0xdf   : > { %425 = vbcast.lane.b32.xlu1 %v419_v33, 264 }
  0xe1   : > { %429 = vbcast.lane.b32.xlu0 %v419_v33, 272 }
  0xe3   : > { %433 = vbcast.lane.b32.xlu1 %v419_v33, 280 }
  0xe5   : > { %437 = vbcast.lane.b32.xlu0 %v419_v33, 288 }
  0xe7   : > { %441 = vbcast.lane.b32.xlu1 %v419_v33, 296 }
  0xe9   : > { %445 = vbcast.lane.b32.xlu0 %v419_v33, 304 }
  0xeb   : > { %449 = vbcast.lane.b32.xlu1 %v419_v33, 312 }
  0xed   : > { %456 = vbcast.lane.b32.xlu0 %v454_v35, 256 }
  0xef   : > { %460 = vbcast.lane.b32.xlu1 %v454_v35, 264 }
  0xf1   : > { %464 = vbcast.lane.b32.xlu0 %v454_v35, 272 }
  0xf3   : > { %468 = vbcast.lane.b32.xlu1 %v454_v35, 280 }
  0xf5   : > { %472 = vbcast.lane.b32.xlu0 %v454_v35, 288 }
  0xf7   : > { %476 = vbcast.lane.b32.xlu1 %v454_v35, 296 }
  0xf9   : > { %480 = vbcast.lane.b32.xlu0 %v454_v35, 304 }
  0xfb   : > { %484 = vbcast.lane.b32.xlu1 %v454_v35, 312 }
 0x12b   : > { %v319_v36 = vpop.xlane.xlu1 %318 }
 0x12c   : > { %v313_v37 = vpop.xlane.xlu0 %312  ;;  %v3056_v50 = vmul.f32 0.00390625, %v319_v36 }
 0x12d   : > { %v3052_v45 = vmul.f32 0.00390625, %v313_v37 }
 0x12f   : > { %v322_v38 = vpop.xlane.xlu1 %321 }
 0x130   : > { %v316_v39 = vpop.xlane.xlu0 %315  ;;  %v3059_v54 = vmul.f32 0.00390625, %v322_v38 }
 0x131   : > { %v3050_v44 = vmul.f32 0.00390625, %v316_v39 }
 0x133   : > { %v328_v40 = vpop.xlane.xlu1 %327 }
 0x134   : > { %v325_v41 = vpop.xlane.xlu0 %324  ;;  %v3065_v60 = vmul.f32 0.00390625, %v328_v40 }
 0x135   : > { %v3061_v55 = vmul.f32 0.00390625, %v325_v41 }
 0x137   : > { %v334_v42 = vpop.xlane.xlu1 %333 }
 0x138   : > { %v331_v43 = vpop.xlane.xlu0 %330  ;;  %v3071_v2 = vmul.f32 0.00390625, %v334_v42 }
 0x139   : > { %v3067_v61 = vmul.f32 0.00390625, %v331_v43 }
 0x13b   : > { %v356_v46 = vpop.permute.xlu1 %355 }
 0x13c   : > { %v519_v47 = vmul.f32 %v356_v46, %v3050_v44  ;;  %v352_v48 = vpop.permute.xlu0 %351 }
 0x13d   : > { %v518_v49 = vmul.f32 %v352_v48, %v3052_v45 }
 0x13e   : > { %586 = vperm.xlu1 %2481, %v519_v47  }
 0x13f   : > { %583 = vperm.xlu0 %2480, %v518_v49   ;;  %v360_v51 = vpop.permute.xlu1 %359 }
 0x140   : > { %v520_v52 = vmul.f32 %v360_v51, %v3056_v50  ;;  %v368_v53 = vpop.permute.xlu0 %367 }
 0x141   : > { %v522_v57 = vmul.f32 %v368_v53, %v3061_v55 }
 0x142   : > { %589 = vperm.xlu1 %2481, %v520_v52  }
 0x143   : > { %v364_v56 = vpop.permute.xlu1 %363 }
 0x144   : > { %v521_v58 = vmul.f32 %v364_v56, %v3059_v54  ;;  %v376_v59 = vpop.permute.xlu0 %375 }
 0x145   : > { %v524_v63 = vmul.f32 %v376_v59, %v3067_v61 }
 0x146   : > { %592 = vperm.xlu0 %2480, %v521_v58   ;;  %595 = vperm.xlu1 %2481, %v522_v57   ;;  %v3095_v58 = vld [vmem:[#allocation8 + $0x8] sm:$0xff] }
 0x147   : > { %v372_v62 = vpop.permute.xlu1 %371 }
 0x148   : > { %v523_v0 = vmul.f32 %v372_v62, %v3065_v60  ;;  %v387_v1 = vpop.permute.xlu0 %386  ;;  %v3102_v62 = vsub.s32 6, %v3032_v25 }
 0x149   : > { %v526_v4 = vmul.f32 %v387_v1, %v3052_v45  ;;  %v3107_v1 = vld [vmem:[#allocation8 + $0x10] sm:$0xff] }
 0x14a   : > { %598 = vperm.xlu0 %2480, %v523_v0   ;;  %601 = vperm.xlu1 %2481, %v524_v63   ;;  %v990_v63 = vrot.slane %v3095_v58, %v3102_v62  ;;  %v2377_v0 = vld [vmem:[#allocation7] ss:$0 sm:$0xff] }
 0x14b   : > { %v380_v3 = vpop.permute.xlu1 %379 }
 0x14c   : > { %v525_v5 = vmul.f32 %v380_v3, %v3071_v2  ;;  %v395_v6 = vpop.permute.xlu0 %394  ;;  %v1004_v3 = vrot.slane %v3107_v1, %v3035_v26 }
 0x14d   : > { %v528_v8 = vmul.f32 %v395_v6, %v3056_v50 }
 0x14e   : > { %604 = vperm.xlu0 %2480, %v525_v5   ;;  %607 = vperm.xlu1 %2481, %v526_v4   ;;  %v1018_v4 = vrot.slane %v3107_v1, %v3043_v32  ;;  %v3116_v5 = vsub.s32 4, %v3032_v25 }
 0x14f   : > { %v391_v7 = vpop.permute.xlu1 %390 }
 0x150   : > { %v527_v9 = vmul.f32 %v391_v7, %v3050_v44  ;;  %v403_v10 = vpop.permute.xlu0 %402  ;;  %v1032_v7 = vrot.slane %v3107_v1, %v3116_v5 }
 0x151   : > { %v530_v12 = vmul.f32 %v403_v10, %v3061_v55  ;;  %v3124_v10 = vld [vmem:[#allocation8 + $0x18] sm:$0xff] }
 0x152   : > { %610 = vperm.xlu0 %2480, %v527_v9   ;;  %613 = vperm.xlu1 %2481, %v528_v8   ;;  %v1046_v9 = vrot.slane %v3107_v1, %v3102_v62 }
 0x153   : > { %v399_v11 = vpop.permute.xlu1 %398 }
 0x154   : > { %v529_v13 = vmul.f32 %v399_v11, %v3059_v54  ;;  %v411_v14 = vpop.permute.xlu0 %410 }
 0x155   : > { %v532_v16 = vmul.f32 %v411_v14, %v3067_v61 }
 0x156   : > { %616 = vperm.xlu0 %2480, %v529_v13   ;;  %619 = vperm.xlu1 %2481, %v530_v12   ;;  %v1060_v12 = vrot.slane %v3124_v10, %v3035_v26  ;;  %v3130_v13 = vsub.s32 5, %v3032_v25 }
 0x157   : > { %v407_v15 = vpop.permute.xlu1 %406 }
 0x158   : > { %v531_v17 = vmul.f32 %v407_v15, %v3065_v60  ;;  %v422_v18 = vpop.permute.xlu0 %421  ;;  %v1074_v15 = vrot.slane %v3124_v10, %v3043_v32 }
 0x159   : > { %v534_v20 = vmul.f32 %v422_v18, %v3052_v45  ;;  %v3139_v18 = vsub.s32 7, %v3032_v25 }
 0x15a   : > { %622 = vperm.xlu0 %2480, %v531_v17   ;;  %625 = vperm.xlu1 %2481, %v532_v16   ;;  %v1088_v17 = vrot.slane %v3124_v10, %v3116_v5 }
 0x15b   : > { %v415_v19 = vpop.permute.xlu1 %414 }
 0x15c   : > { %v533_v21 = vmul.f32 %v415_v19, %v3071_v2  ;;  %v430_v22 = vpop.permute.xlu0 %429 }
 0x15d   : > { %v536_v27 = vmul.f32 %v430_v22, %v3056_v50  ;;  %v955_v22 = vrot.slane %v3095_v58, %v3039_v30 }
 0x15e   : > { %628 = vperm.xlu0 %2480, %v533_v21   ;;  %631 = vperm.xlu1 %2481, %v534_v20   ;;  %v1102_v20 = vrot.slane %v3124_v10, %v3102_v62  ;;  %v3144_v21 = vld [vmem:[#allocation8 + $0x20] sm:$0xff] }
 0x15f   : > { %v426_v23 = vpop.permute.xlu1 %425 }
 0x160   : > { %v535_v28 = vmul.f32 %v426_v23, %v3050_v44  ;;  %v438_v29 = vpop.permute.xlu0 %437  ;;  %v1116_v23 = vrot.slane %v3144_v21, %v3035_v26 }
 0x161   : > { %v538_v33 = vmul.f32 %v438_v29, %v3061_v55  ;;  %v969_v29 = vrot.slane %v3095_v58, %v3047_v34 }
 0x162   : > { %634 = vperm.xlu0 %2480, %v535_v28   ;;  %637 = vperm.xlu1 %2481, %v536_v27   ;;  %v962_v27 = vrot.slane %v3095_v58, %v3043_v32  ;;  %v1130_v28 = vrot.slane %v3144_v21, %v3043_v32 }
 0x163   : > { %v434_v31 = vpop.permute.xlu1 %433 }
 0x164   : > { %v537_v35 = vmul.f32 %v434_v31, %v3059_v54  ;;  %v446_v36 = vpop.permute.xlu0 %445  ;;  %v1144_v31 = vrot.slane %v3144_v21, %v3116_v5 }
 0x165   : > { %v540_v38 = vmul.f32 %v446_v36, %v3067_v61  ;;  %v3162_v36 = vld [vmem:[#allocation8 + $0x28] sm:$0xff] }
 0x166   : > { %640 = vperm.xlu0 %2480, %v537_v35   ;;  %643 = vperm.xlu1 %2481, %v538_v33   ;;  %v976_v33 = vrot.slane %v3095_v58, %v3116_v5  ;;  %v1158_v35 = vrot.slane %v3144_v21, %v3102_v62 }
 0x167   : > { %v442_v37 = vpop.permute.xlu1 %441 }
 0x168   : > { %v539_v39 = vmul.f32 %v442_v37, %v3065_v60  ;;  %v457_v40 = vpop.permute.xlu0 %456  ;;  %v983_v37 = vrot.slane %v3095_v58, %v3130_v13 }
 0x169   : > { %v542_v42 = vmul.f32 %v457_v40, %v3052_v45  ;;  %v1186_v40 = vrot.slane %v3162_v36, %v3043_v32 }
 0x16a   : > { %646 = vperm.xlu0 %2480, %v539_v39   ;;  %649 = vperm.xlu1 %2481, %v540_v38   ;;  %v1172_v38 = vrot.slane %v3162_v36, %v3035_v26  ;;  %v997_v39 = vrot.slane %v3095_v58, %v3139_v18 }
 0x16b   : > { %v450_v41 = vpop.permute.xlu1 %449 }
 0x16c   : > { %v541_v43 = vmul.f32 %v450_v41, %v3071_v2  ;;  %v465_v46 = vpop.permute.xlu0 %464  ;;  %v1011_v41 = vrot.slane %v3107_v1, %v3039_v30 }
 0x16d   : > { %v544_v48 = vmul.f32 %v465_v46, %v3056_v50  ;;  %v1025_v46 = vrot.slane %v3107_v1, %v3047_v34 }
 0x16e   : > { %652 = vperm.xlu0 %2480, %v541_v43   ;;  %655 = vperm.xlu1 %2481, %v542_v42   ;;  %v1200_v42 = vrot.slane %v3162_v36, %v3116_v5 }
 0x16f   : > { %v461_v47 = vpop.permute.xlu1 %460 }
 0x170   : > { %v543_v49 = vmul.f32 %v461_v47, %v3050_v44  ;;  %v473_v51 = vpop.permute.xlu0 %472  ;;  %v948_v44 = vrot.slane %v3095_v58, %v3035_v26  ;;  %v1214_v47 = vrot.slane %v3162_v36, %v3102_v62 }
 0x171   : > { %v546_v53 = vmul.f32 %v473_v51, %v3061_v55 }
 0x172   : > { %658 = vperm.xlu0 %2480, %v543_v49   ;;  %661 = vperm.xlu1 %2481, %v544_v48   ;;  %v3182_v48 = vld [vmem:[#allocation8 + $0x30] sm:$0xff] }
 0x173   : > { %v469_v52 = vpop.permute.xlu1 %468  ;;  %v1242_v58 = vrot.slane %v3182_v48, %v3043_v32 }
 0x174   : > { %v545_v56 = vmul.f32 %v469_v52, %v3059_v54  ;;  %v481_v57 = vpop.permute.xlu0 %480  ;;  %v1039_v52 = vrot.slane %v3107_v1, %v3130_v13 }
 0x175   : > { %v548_v59 = vmul.f32 %v481_v57, %v3067_v61  ;;  %v873_v61 = vld [vmem:[#allocation8] sm:$0xff] }
 0x176   : > { %664 = vperm.xlu0 %2480, %v545_v56   ;;  %667 = vperm.xlu1 %2481, %v546_v53   ;;  %v906_v6 = vrot.slane %v873_v61, %v3043_v32  ;;  %v913_v8 = vrot.slane %v873_v61, %v3047_v34  ;;  %v920_v11 = vrot.slane %v873_v61, %v3116_v5 }
 0x177   : > { %v477_v45 = vpop.permute.xlu1 %476  ;;  %v927_v14 = vrot.slane %v873_v61, %v3130_v13  ;;  %v934_v16 = vrot.slane %v873_v61, %v3102_v62  ;;  %v941_v19 = vrot.slane %v873_v61, %v3139_v18  ;;  %v1228_v53 = vrot.slane %v3182_v48, %v3035_v26 }
 0x178   : > { %v547_v50 = vmul.f32 %v477_v45, %v3065_v60  ;;  %v892_v60 = vrot.slane %v873_v61, %v3035_v26  ;;  %v1053_v45 = vrot.slane %v3107_v1, %v3139_v18 }
 0x17a   : > { %670 = vperm.xlu0 %2480, %v547_v50   ;;  %673 = vperm.xlu1 %2481, %v548_v59  }
 0x17b   : > { %v485_v55 = vpop.permute.xlu1 %484 }
 0x17c   : > { %v549_v54 = vmul.f32 %v485_v55, %v3071_v2  ;;  %v899_v2 = vrot.slane %v873_v61, %v3039_v30  ;;  %v1256_v55 = vrot.slane %v3182_v48, %v3116_v5  ;;  %v1270_v61 = vrot.slane %v3182_v48, %v3102_v62 }
 0x17e   : > { %676 = vperm.xlu0 %2480, %v549_v54   ;;  %950 = vbcast.lane.b32.xlu1 %v948_v44, 256  ;;  %v1067_v44 = vrot.slane %v3124_v10, %v3039_v30 }
 0x182   : > { %868 = vbcast.lane.b32.xlu0 %v2377_v0, 256  ;;  %992 = vbcast.lane.b32.xlu1 %v990_v63, 256  ;;  %v1081_v0 = vrot.slane %v3124_v10, %v3047_v34 }
 0x186   : > { %894 = vbcast.lane.b32.xlu0 %v892_v60, 256  ;;  %1006 = vbcast.lane.b32.xlu1 %v1004_v3, 256  ;;  %v1095_v3 = vrot.slane %v3124_v10, %v3130_v13 }
 0x18a   : > { %901 = vbcast.lane.b32.xlu0 %v899_v2, 256  ;;  %1020 = vbcast.lane.b32.xlu1 %v1018_v4, 256 }
 0x18e   : > { %908 = vbcast.lane.b32.xlu0 %v906_v6, 256  ;;  %1034 = vbcast.lane.b32.xlu1 %v1032_v7, 256  ;;  %v1109_v6 = vrot.slane %v3124_v10, %v3139_v18 }
 0x192   : > { %915 = vbcast.lane.b32.xlu0 %v913_v8, 256  ;;  %1048 = vbcast.lane.b32.xlu1 %v1046_v9, 256  ;;  %v1123_v9 = vrot.slane %v3144_v21, %v3039_v30 }
 0x196   : > { %922 = vbcast.lane.b32.xlu0 %v920_v11, 256  ;;  %1062 = vbcast.lane.b32.xlu1 %v1060_v12, 256 }
 0x19a   : > { %929 = vbcast.lane.b32.xlu0 %v927_v14, 256  ;;  %1076 = vbcast.lane.b32.xlu1 %v1074_v15, 256  ;;  %v1137_v14 = vrot.slane %v3144_v21, %v3047_v34  ;;  %v679_v15 = vand.u32 127, %v346_v24 }
 0x19e   : > { %936 = vbcast.lane.b32.xlu0 %v934_v16, 256  ;;  %1090 = vbcast.lane.b32.xlu1 %v1088_v17, 256  ;;  %v1151_v17 = vrot.slane %v3144_v21, %v3130_v13 }
 0x1a2   : > { %943 = vbcast.lane.b32.xlu0 %v941_v19, 256  ;;  %1104 = vbcast.lane.b32.xlu1 %v1102_v20, 256  ;;  %v684_v19 = vadd.s32 4294967288, %v679_v15 }
 0x1a4   : > { %v687_v24 = vsub.s32 %v684_v19, %v3032_v25 }
 0x1a6   : > { %957 = vbcast.lane.b32.xlu0 %v955_v22, 256  ;;  %1118 = vbcast.lane.b32.xlu1 %v1116_v23, 256  ;;  %v1165_v23 = vrot.slane %v3144_v21, %v3139_v18 }
 0x1aa   : > { %964 = vbcast.lane.b32.xlu0 %v962_v27, 256  ;;  %1132 = vbcast.lane.b32.xlu1 %v1130_v28, 256  ;;  %v691_v27 = vadd.s32 4294967280, %v679_v15  ;;  %v705_v28 = vadd.s32 4294967264, %v679_v15 }
 0x1ac   : > { %v694_v21 = vsub.s32 %v691_v27, %v3032_v25 }
 0x1ae   : > { %971 = vbcast.lane.b32.xlu0 %v969_v29, 256  ;;  %1146 = vbcast.lane.b32.xlu1 %v1144_v31, 256  ;;  %v698_v29 = vadd.s32 4294967272, %v679_v15  ;;  %v719_v31 = vadd.s32 4294967248, %v679_v15 }
 0x1b2   : > { %978 = vbcast.lane.b32.xlu0 %v976_v33, 256  ;;  %1160 = vbcast.lane.b32.xlu1 %v1158_v35, 256 }
 0x1b6   : > { %985 = vbcast.lane.b32.xlu0 %v983_v37, 256  ;;  %1174 = vbcast.lane.b32.xlu1 %v1172_v38, 256  ;;  %v3253_v37 = vsub.s32 %v679_v15, %v3032_v25  ;;  %v712_v38 = vadd.s32 4294967256, %v679_v15 }
 0x1ba   : > { %999 = vbcast.lane.b32.xlu0 %v997_v39, 256  ;;  %1188 = vbcast.lane.b32.xlu1 %v1186_v40, 256  ;;  %v1179_v39 = vrot.slane %v3162_v36, %v3039_v30  ;;  %v726_v40 = vadd.s32 4294967240, %v679_v15 }
 0x1bd   : > { %v3176_v43 = vpop.permute.xlu1 %586 }
 0x1be   : > { %1013 = vbcast.lane.b32.xlu0 %v1011_v41, 256  ;;  %1202 = vbcast.lane.b32.xlu1 %v1200_v42, 256  ;;  %v3184_v49 = vpop.permute.xlu0 %583  ;;  %v3259_v42 = vsub.s32 %v705_v28, %v3032_v25 }
 0x1c1   : > { %v3186_v51 = vpop.permute.xlu1 %589 }
 0x1c2   : > { %1027 = vbcast.lane.b32.xlu0 %v1025_v46, 256  ;;  %1216 = vbcast.lane.b32.xlu1 %v1214_v47, 256  ;;  %v701_v46 = vsub.s32 %v698_v29, %v3032_v25  ;;  %v3263_v47 = vsub.s32 %v719_v31, %v3032_v25  ;;  %v695_v15 = vrot.slane %v3186_v51, %v694_v21 }
 0x1c5   : > { %v3192_v56 = vpop.permute.xlu1 %595  ;;  %v3194_v57 = vpop.permute.xlu0 %592 }
 0x1c6   : > { %1041 = vbcast.lane.b32.xlu0 %v1039_v52, 256  ;;  %1230 = vbcast.lane.b32.xlu1 %v1228_v53, 256  ;;  %v709_v31 = vrot.slane %v3192_v56, %v3259_v42 }
 0x1c9   : > { %v3200_v59 = vpop.permute.xlu1 %601  ;;  %v3202_v50 = vpop.permute.xlu0 %598 }
 0x1ca   : > { %1055 = vbcast.lane.b32.xlu0 %v1053_v45, 256  ;;  %1244 = vbcast.lane.b32.xlu1 %v1242_v58, 256 }
 0x1cd   : > { %v3208_v54 = vpop.permute.xlu1 %607  ;;  %v3210_v63 = vpop.permute.xlu0 %604 }
 0x1ce   : > { %1069 = vbcast.lane.b32.xlu0 %v1067_v44, 256  ;;  %1258 = vbcast.lane.b32.xlu1 %v1256_v55, 256  ;;  %v736_v52 = vrot.slane %v3208_v54, %v3253_v37  ;;  %v3270_v44 = vsub.s32 %v712_v38, %v3032_v25 }
 0x1d1   : > { %v3216_v1 = vpop.permute.xlu1 %613  ;;  %v611_v60 = vpop.permute.xlu0 %610 }
 0x1d2   : > { %1083 = vbcast.lane.b32.xlu0 %v1081_v0, 256  ;;  %1272 = vbcast.lane.b32.xlu1 %v1270_v61, 256  ;;  %v740_v41 = vrot.slane %v611_v60, %v687_v24  ;;  %v745_v55 = vrot.slane %v3216_v1, %v694_v21  ;;  %v1193_v0 = vrot.slane %v3162_v36, %v3047_v34 }
 0x1d3   : > { %v3276_v61 = vsub.s32 %v726_v40, %v3032_v25  ;;  %v702_v25 = vrot.slane %v3194_v57, %v701_v46 }
 0x1d4   : > { %v741_v60 = vsel %vm689_vm0, %v740_v41, %v736_v52 }
 0x1d5   : > { %v3220_v2 = vpop.permute.xlu1 %619  ;;  %v3222_v4 = vpop.permute.xlu0 %616 }
 0x1d6   : > { %1097 = vbcast.lane.b32.xlu0 %v1095_v3, 256  ;;  %v750_v54 = vrot.slane %v3222_v4, %v701_v46 }
 0x1d9   : > { %v3226_v7 = vpop.permute.xlu1 %625  ;;  %v3228_v8 = vpop.permute.xlu0 %622 }
 0x1da   : > { %1111 = vbcast.lane.b32.xlu0 %v1109_v6, 256  ;;  %v688_v6 = vrot.slane %v3176_v43, %v687_v24  ;;  %v755_v43 = vrot.slane %v3220_v2, %v3259_v42  ;;  %v760_v57 = vrot.slane %v3228_v8, %v3270_v44  ;;  %v765_v52 = vrot.slane %v3226_v7, %v3263_v47 }
 0x1dd   : > { %v632_v11 = vpop.permute.xlu1 %631  ;;  %v3232_v12 = vpop.permute.xlu0 %628 }
 0x1de   : > { %1125 = vbcast.lane.b32.xlu0 %v1123_v9, 256  ;;  %v775_v3 = vrot.slane %v632_v11, %v3253_v37  ;;  %v683_v9 = vrot.slane %v3184_v49, %v3253_v37  ;;  %v746_v49 = vsel %vm696_vm1, %v745_v55, %v741_v60 }
 0x1df   : > { %v751_v51 = vsel %vm703_vm2, %v750_v54, %v746_v49 }
 0x1e0   : > { %v690_v27 = vsel %vm689_vm0, %v688_v6, %v683_v9  ;;  %v756_v40 = vsel %vm710_vm3, %v755_v43, %v751_v51 }
 0x1e1   : > { %v3237_v16 = vpop.permute.xlu1 %637  ;;  %v635_v10 = vpop.permute.xlu0 %634  ;;  %v761_v56 = vsel %vm717_vm4, %v760_v57, %v756_v40 }
 0x1e2   : > { %1139 = vbcast.lane.b32.xlu0 %v1137_v14, 256  ;;  %v779_v53 = vrot.slane %v635_v10, %v687_v24  ;;  %v784_v1 = vrot.slane %v3237_v16, %v694_v21  ;;  %v1207_v14 = vrot.slane %v3162_v36, %v3130_v13  ;;  %v766_v9 = vsel %vm724_vm5, %v765_v52, %v761_v56 }
 0x1e4   : > { %v780_v10 = vsel %vm689_vm0, %v779_v53, %v775_v3 }
 0x1e5   : > { %v3241_v20 = vpop.permute.xlu1 %643  ;;  %v3243_v22 = vpop.permute.xlu0 %640  ;;  %v785_v28 = vsel %vm696_vm1, %v784_v1, %v780_v10 }
 0x1e6   : > { %1153 = vbcast.lane.b32.xlu0 %v1151_v17, 256  ;;  %v789_v4 = vrot.slane %v3243_v22, %v701_v46  ;;  %v1221_v22 = vrot.slane %v3162_v36, %v3139_v18  ;;  %v794_v2 = vrot.slane %v3241_v20, %v3259_v42  ;;  %v716_v20 = vrot.slane %v3202_v50, %v3270_v44 }
 0x1e8   : > { %v790_v8 = vsel %vm703_vm2, %v789_v4, %v785_v28 }
 0x1e9   : > { %v3248_v33 = vpop.permute.xlu1 %649  ;;  %v3250_v35 = vpop.permute.xlu0 %646  ;;  %v795_v50 = vsel %vm710_vm3, %v794_v2, %v790_v8 }
 0x1ea   : > { %1167 = vbcast.lane.b32.xlu0 %v1165_v23, 256  ;;  %v799_v38 = vrot.slane %v3250_v35, %v3270_v44  ;;  %v804_v55 = vrot.slane %v3248_v33, %v3263_v47  ;;  %v730_v33 = vrot.slane %v3210_v63, %v3276_v61 }
 0x1ec   : > { %v800_v60 = vsel %vm717_vm4, %v799_v38, %v795_v50 }
 0x1ed   : > { %v656_v45 = vpop.permute.xlu1 %655  ;;  %v3267_v58 = vpop.permute.xlu0 %652 }
 0x1ee   : > { %1181 = vbcast.lane.b32.xlu0 %v1179_v39, 256  ;;  %v814_v16 = vrot.slane %v656_v45, %v3253_v37  ;;  %v770_v45 = vrot.slane %v3232_v12, %v3276_v61 }
 0x1f1   : > { %v662_v17 = vpop.permute.xlu1 %661  ;;  %v659_v11 = vpop.permute.xlu0 %658 }
 0x1f2   : > { %v818_v19 = vrot.slane %v659_v11, %v687_v24  ;;  %1195 = vbcast.lane.b32.xlu0 %v1193_v0, 256  ;;  %v823_v23 = vrot.slane %v662_v17, %v694_v21  ;;  %v697_v24 = vsel %vm696_vm1, %v695_v15, %v690_v27  ;;  %v723_v0 = vrot.slane %v3200_v59, %v3263_v47 }
 0x1f3   : > { %v704_v21 = vsel %vm703_vm2, %v702_v25, %v697_v24  ;;  %v1235_v59 = vrot.slane %v3182_v48, %v3039_v30  ;;  %v805_v15 = vsel %vm724_vm5, %v804_v55, %v800_v60 }
 0x1f4   : > { %v819_v29 = vsel %vm689_vm0, %v818_v19, %v814_v16  ;;  %v711_v7 = vsel %vm710_vm3, %v709_v31, %v704_v21 }
 0x1f5   : > { %v668_v36 = vpop.permute.xlu1 %667  ;;  %v665_v39 = vpop.permute.xlu0 %664  ;;  %v824_v35 = vsel %vm696_vm1, %v823_v23, %v819_v29  ;;  %v718_v12 = vsel %vm717_vm4, %v716_v20, %v711_v7  ;;  %v1277_v23 = vrot.slane %v3182_v48, %v3139_v18 }
 0x1f6   : > { %v828_v41 = vrot.slane %v665_v39, %v701_v46  ;;  %1209 = vbcast.lane.b32.xlu0 %v1207_v14, 256  ;;  %v833_v53 = vrot.slane %v668_v36, %v3259_v42  ;;  %v809_v42 = vrot.slane %v3267_v58, %v3276_v61  ;;  %v771_v14 = vsel %vm731_vm6, %v770_v45, %v766_v9 }
 0x1f7   : > { %v725_v63 = vsel %vm724_vm5, %v723_v0, %v718_v12 }
 0x1f8   : > { %v829_v46 = vsel %vm703_vm2, %v828_v41, %v824_v35  ;;  %v732_v4 = vsel %vm731_vm6, %v730_v33, %v725_v63 }
 0x1f9   : > { %v674_v54 = vpop.permute.xlu1 %673  ;;  %v671_v3 = vpop.permute.xlu0 %670  ;;  %v834_v58 = vsel %vm710_vm3, %v833_v53, %v829_v46  ;;  %v851_v43 = vsel %vm850_vm7, %v771_v14, %v732_v4 }
 0x1fa   : > { %v838_v6 = vrot.slane %v671_v3, %v3270_v44  ;;  %1223 = vbcast.lane.b32.xlu0 %v1221_v22, 256  ;;  %v843_v1 = vrot.slane %v674_v54, %v3263_v47  ;;  %v810_v44 = vsel %vm731_vm6, %v809_v42, %v805_v15  ;;  %v1249_v47 = vrot.slane %v3182_v48, %v3047_v34  ;;  %v880_v22 = vld [vmem:[#allocation8 + $0x38] sm:$0xff] }
 0x1fb   : > { %v853_v16 = vsel %vm852_vm8, %v810_v44, %v851_v43  ;;  %v1291_v2 = vrot.slane %v880_v22, %v3039_v30  ;;  %v1305_v29 = vrot.slane %v880_v22, %v3047_v34  ;;  %v1284_v31 = vrot.slane %v880_v22, %v3035_v26 }
 0x1fc   : > { %v839_v25 = vsel %vm717_vm4, %v838_v6, %v834_v58  ;;  %v1319_v8 = vrot.slane %v880_v22, %v3130_v13  ;;  %v1333_v30 = vrot.slane %v880_v22, %v3139_v18  ;;  %v1312_v39 = vrot.slane %v880_v22, %v3116_v5 }
 0x1fd   : > { %v677_v10 = vpop.permute.xlu0 %676  ;;  %v844_v11 = vsel %vm724_vm5, %v843_v1, %v839_v25  ;;  %v3364_v28 = vpop.permute.xlu1 %950  ;;  %v1326_v26 = vrot.slane %v880_v22, %v3102_v62 }
 0x1fe   : > { %v848_v17 = vrot.slane %v677_v10, %v3276_v61  ;;  %1237 = vbcast.lane.b32.xlu0 %v1235_v59, 256  ;;  %v1263_v61 = vrot.slane %v3182_v48, %v3130_v13  ;;  %v1298_v48 = vrot.slane %v880_v22, %v3043_v32 }
 0x200   : > { %v849_v49 = vsel %vm731_vm6, %v848_v17, %v844_v11 }
 0x201   : > { %v855_v19 = vsel %vm854_vm9, %v849_v49, %v853_v16  ;;  %v3357_v57 = vpop.permute.xlu0 %868  ;;  %v3369_v38 = vpop.permute.xlu1 %992 }
 0x202   : > { %v858_v51 = vsel %vm857_vm10, %v855_v19, 0.0  ;;  %1251 = vbcast.lane.b32.xlu0 %v1249_v47, 256 }
 0x203   : > { %859 = vadd.xlane.f32.xlu1 %v858_v51 }
 0x205   : > { %v3361_v27 = vpop.permute.xlu0 %894  ;;  %v3374_v21 = vpop.permute.xlu1 %1006 }
 0x206   : > { %1265 = vbcast.lane.b32.xlu0 %v1263_v61, 256 }
 0x209   : > { %v902_v24 = vpop.permute.xlu0 %901  ;;  %v3377_v13 = vpop.permute.xlu1 %1020 }
 0x20a   : > { %1279 = vbcast.lane.b32.xlu0 %v1277_v23, 256 }
 0x20d   : > { %v909_v36 = vpop.permute.xlu0 %908  ;;  %v3379_v40 = vpop.permute.xlu1 %1034 }
 0x20e   : > { %1293 = vbcast.lane.b32.xlu0 %v1291_v2, 256 }
 0x211   : > { %v916_v34 = vpop.permute.xlu0 %915  ;;  %v3381_v41 = vpop.permute.xlu1 %1048 }
 0x212   : > { %1307 = vbcast.lane.b32.xlu0 %v1305_v29, 256 }
 0x214   : > { %1286 = vbcast.lane.b32.xlu1 %v1284_v31, 256 }
 0x215   : > { %v923_v20 = vpop.permute.xlu0 %922  ;;  %v3383_v52 = vpop.permute.xlu1 %1062 }
 0x216   : > { %1321 = vbcast.lane.b32.xlu0 %v1319_v8, 256 }
 0x218   : > { %1300 = vbcast.lane.b32.xlu1 %v1298_v48, 256 }
 0x219   : > { %v930_v32 = vpop.permute.xlu0 %929  ;;  %v3385_v56 = vpop.permute.xlu1 %1076 }
 0x21a   : > { %1335 = vbcast.lane.b32.xlu0 %v1333_v30, 256 }
 0x21c   : > { %1314 = vbcast.lane.b32.xlu1 %v1312_v39, 256 }
 0x21d   : > { %v937_v18 = vpop.permute.xlu0 %936  ;;  %v3387_v35 = vpop.permute.xlu1 %1090 }
 0x220   : > { %1328 = vbcast.lane.b32.xlu1 %v1326_v26, 256 }
 0x221   : > { %v944_v5 = vpop.permute.xlu0 %943  ;;  %v3389_v62 = vpop.permute.xlu1 %1104 }
 0x225   : > { %v958_v53 = vpop.permute.xlu0 %957  ;;  %v3391_v50 = vpop.permute.xlu1 %1118 }
 0x229   : > { %v965_v45 = vpop.permute.xlu0 %964  ;;  %v3393_v0 = vpop.permute.xlu1 %1132 }
 0x22d   : > { %v972_v55 = vpop.permute.xlu0 %971  ;;  %v3395_v60 = vpop.permute.xlu1 %1146 }
 0x231   : > { %v979_v46 = vpop.permute.xlu0 %978  ;;  %v3397_v54 = vpop.permute.xlu1 %1160 }
 0x235   : > { %v986_v7 = vpop.permute.xlu0 %985  ;;  %v3399_v12 = vpop.permute.xlu1 %1174 }
 0x239   : > { %v1000_v42 = vpop.permute.xlu0 %999  ;;  %v3401_v6 = vpop.permute.xlu1 %1188 }
 0x23d   : > { %v1014_v3 = vpop.permute.xlu0 %1013  ;;  %v3405_v9 = vpop.permute.xlu1 %1202 }
 0x241   : > { %v1028_v33 = vpop.permute.xlu0 %1027  ;;  %v3409_v58 = vpop.permute.xlu1 %1216 }
 0x245   : > { %v3403_v59 = vpop.permute.xlu0 %1041  ;;  %v3413_v15 = vpop.permute.xlu1 %1230 }
 0x249   : > { %v3407_v1 = vpop.permute.xlu0 %1055  ;;  %v3417_v63 = vpop.permute.xlu1 %1244 }
 0x24d   : > { %v3411_v14 = vpop.permute.xlu0 %1069  ;;  %v3421_v10 = vpop.permute.xlu1 %1258 }
 0x251   : > { %v3415_v25 = vpop.permute.xlu0 %1083  ;;  %v3425_v17 = vpop.permute.xlu1 %1272 }
 0x255   : > { %v3419_v44 = vpop.permute.xlu0 %1097 }
 0x259   : > { %v3423_v4 = vpop.permute.xlu0 %1111 }
 0x25d   : > { %v3427_v47 = vpop.permute.xlu0 %1125 }
 0x261   : > { %v3430_v49 = vpop.permute.xlu0 %1139 }
 0x265   : > { %v3437_v61 = vpop.permute.xlu0 %1153 }
 0x269   : > { %v3443_v29 = vpop.permute.xlu0 %1167 }
 0x26d   : > { %v1182_v31 = vpop.permute.xlu0 %1181 }
 0x271   : > { %v3452_v39 = vpop.permute.xlu0 %1195 }
 0x290   : > { %v860_v11 = vpop.xlane.xlu1 %859 }
 0x291   : > { %v871_v43 = vadd.f32 %v3357_v57, %v860_v11 }
 0x293   : > { %v3432_v16 = vmax.f32 %v871_v43, 0.0 }
 0x295   : > { %v1401_v19 = vmul.f32 %v3361_v27, %v3432_v16  ;;  %v1402_v51 = vmul.f32 %v902_v24, %v3432_v16  ;;  %v1403_v23 = vmul.f32 %v909_v36, %v3432_v16  ;;  %v1404_v22 = vmul.f32 %v916_v34, %v3432_v16 }
 0x296   : > { %v1405_v57 = vmul.f32 %v923_v20, %v3432_v16  ;;  %v1406_v2 = vmul.f32 %v930_v32, %v3432_v16  ;;  %v1407_v27 = vmul.f32 %v937_v18, %v3432_v16  ;;  %v1408_v24 = vmul.f32 %v944_v5, %v3432_v16  ;;  %v3456_v20 = vpop.permute.xlu0 %1209 }
 0x297   : > { %1530 = vperm.xlu1 %2481, %v1401_v19   ;;  %1533 = vperm.xlu0 %2480, %v1402_v51   ;;  %v1409_v8 = vmul.f32 %v3364_v28, %v3432_v16  ;;  %v1410_v48 = vmul.f32 %v958_v53, %v3432_v16  ;;  %v1411_v36 = vmul.f32 %v965_v45, %v3432_v16 }
 0x298   : > { %v1412_v30 = vmul.f32 %v972_v55, %v3432_v16  ;;  %v1413_v34 = vmul.f32 %v979_v46, %v3432_v16  ;;  %v1414_v26 = vmul.f32 %v986_v7, %v3432_v16  ;;  %v1415_v28 = vmul.f32 %v3369_v38, %v3432_v16 }
 0x299   : > { %v1416_v32 = vmul.f32 %v1000_v42, %v3432_v16  ;;  %v1417_v18 = vmul.f32 %v3374_v21, %v3432_v16  ;;  %v1418_v5 = vmul.f32 %v1014_v3, %v3432_v16  ;;  %v1419_v45 = vmul.f32 %v3377_v13, %v3432_v16 }
 0x29a   : > { %v3464_v53 = vpop.permute.xlu0 %1223  ;;  %v1420_v55 = vmul.f32 %v1028_v33, %v3432_v16  ;;  %v1421_v46 = vmul.f32 %v3379_v40, %v3432_v16  ;;  %v1422_v21 = vmul.f32 %v3403_v59, %v3432_v16  ;;  %v1423_v7 = vmul.f32 %v3381_v41, %v3432_v16 }
 0x29b   : > { %1536 = vperm.xlu1 %2481, %v1403_v23   ;;  %1539 = vperm.xlu0 %2480, %v1404_v22   ;;  %v1424_v42 = vmul.f32 %v3407_v1, %v3432_v16  ;;  %v1425_v3 = vmul.f32 %v3383_v52, %v3432_v16  ;;  %v1426_v40 = vmul.f32 %v3411_v14, %v3432_v16 }
 0x29c   : > { %v1433_v59 = vmul.f32 %v3391_v50, %v3432_v16  ;;  %v1434_v41 = vmul.f32 %v3427_v47, %v3432_v16  ;;  %v1441_v1 = vmul.f32 %v3399_v12, %v3432_v16  ;;  %v1442_v11 = vmul.f32 %v1182_v31, %v3432_v16  ;;  %v1287_v50 = vpop.permute.xlu1 %1286 }
 0x29d   : > { %v1449_v14 = vmul.f32 %v3413_v15, %v3432_v16  ;;  %v1457_v19 = vmul.f32 %v1287_v50, %v3432_v16  ;;  %v1427_v12 = vmul.f32 %v3385_v56, %v3432_v16  ;;  %v1435_v23 = vmul.f32 %v3393_v0, %v3432_v16 }
 0x29e   : > { %v1238_v38 = vpop.permute.xlu0 %1237  ;;  %v1443_v15 = vmul.f32 %v3401_v6, %v3432_v16  ;;  %v1451_v22 = vmul.f32 %v3417_v63, %v3432_v16  ;;  %v1436_v56 = vmul.f32 %v3430_v49, %v3432_v16  ;;  %v1444_v0 = vmul.f32 %v3452_v39, %v3432_v16 }
 0x29f   : > { %1542 = vperm.xlu1 %2481, %v1405_v57   ;;  %1545 = vperm.xlu0 %2480, %v1406_v2   ;;  %v1450_v43 = vmul.f32 %v1238_v38, %v3432_v16  ;;  %v1437_v31 = vmul.f32 %v3395_v60, %v3432_v16  ;;  %v1445_v49 = vmul.f32 %v3405_v9, %v3432_v16 }
 0x2a0   : > { %v1301_v57 = vpop.permute.xlu1 %1300  ;;  %v1446_v60 = vmul.f32 %v3456_v20, %v3432_v16 }
 0x2a1   : > { %v1459_v2 = vmul.f32 %v1301_v57, %v3432_v16 }
 0x2a2   : > { %v1252_v13 = vpop.permute.xlu0 %1251 }
 0x2a3   : > { %1548 = vperm.xlu1 %2481, %v1407_v27   ;;  %1551 = vperm.xlu0 %2480, %v1408_v24   ;;  %v1428_v27 = vmul.f32 %v3415_v25, %v3432_v16  ;;  %v1452_v6 = vmul.f32 %v1252_v13, %v3432_v16  ;;  %v1429_v25 = vmul.f32 %v3387_v35, %v3432_v16 }
 0x2a4   : > { %v1438_v35 = vmul.f32 %v3437_v61, %v3432_v16  ;;  %v1447_v61 = vmul.f32 %v3409_v58, %v3432_v16 }
 0x2a6   : > { %v1266_v33 = vpop.permute.xlu0 %1265 }
 0x2a7   : > { %1554 = vperm.xlu1 %2481, %v1409_v8   ;;  %1557 = vperm.xlu0 %2480, %v1410_v48   ;;  %v1453_v8 = vmul.f32 %v3421_v10, %v3432_v16  ;;  %v1315_v48 = vpop.permute.xlu1 %1314  ;;  %v1454_v10 = vmul.f32 %v1266_v33, %v3432_v16 }
 0x2aa   : > { %v3488_v52 = vpop.permute.xlu0 %1279 }
 0x2ab   : > { %1560 = vperm.xlu1 %2481, %v1411_v36   ;;  %1563 = vperm.xlu0 %2480, %v1412_v30   ;;  %v1461_v36 = vmul.f32 %v1315_v48, %v3432_v16  ;;  %v1430_v30 = vmul.f32 %v3419_v44, %v3432_v16  ;;  %v1431_v44 = vmul.f32 %v3389_v62, %v3432_v16  ;;  %v1329_v20 = vpop.permute.xlu1 %1328 }
 0x2ac   : > { %v1440_v62 = vmul.f32 %v3443_v29, %v3432_v16 }
 0x2ae   : > { %v1294_v47 = vpop.permute.xlu0 %1293 }
 0x2af   : > { %1566 = vperm.xlu1 %2481, %v1413_v34   ;;  %1569 = vperm.xlu0 %2480, %v1414_v26   ;;  %v1458_v51 = vmul.f32 %v1294_v47, %v3432_v16  ;;  %v1439_v34 = vmul.f32 %v3397_v54, %v3432_v16  ;;  %v1455_v26 = vmul.f32 %v3425_v17, %v3432_v16 }
 0x2b0   : > { %v1448_v54 = vmul.f32 %v3464_v53, %v3432_v16  ;;  %v1456_v17 = vmul.f32 %v3488_v52, %v3432_v16 }
 0x2b2   : > { %v1308_v63 = vpop.permute.xlu0 %1307 }
 0x2b3   : > { %1572 = vperm.xlu1 %2481, %v1415_v28   ;;  %1575 = vperm.xlu0 %2480, %v1416_v32   ;;  %v1460_v24 = vmul.f32 %v1308_v63, %v3432_v16  ;;  %v1463_v28 = vmul.f32 %v1329_v20, %v3432_v16  ;;  %v1432_v32 = vmul.f32 %v3423_v4, %v3432_v16 }
 0x2b6   : > { %v1322_v9 = vpop.permute.xlu0 %1321 }
 0x2b7   : > { %1578 = vperm.xlu1 %2481, %v1417_v18   ;;  %1581 = vperm.xlu0 %2480, %v1418_v5   ;;  %v1462_v39 = vmul.f32 %v1322_v9, %v3432_v16  ;;  %v3547_v5 = vld [vmem:[#allocation10] ss:$0 sm:$0xff] }
 0x2ba   : > { %v1336_v58 = vpop.permute.xlu0 %1335 }
 0x2bb   : > { %1584 = vperm.xlu1 %2481, %v1419_v45   ;;  %1587 = vperm.xlu0 %2480, %v1420_v55   ;;  %v1464_v18 = vmul.f32 %v1336_v58, %v3432_v16 }
 0x2bf   : > { %1590 = vperm.xlu1 %2481, %v1421_v46   ;;  %1593 = vperm.xlu0 %2480, %v1422_v21  }
 0x2c3   : > { %1596 = vperm.xlu1 %2481, %v1423_v7   ;;  %1599 = vperm.xlu0 %2480, %v1424_v42  }
 0x2c7   : > { %1602 = vperm.xlu1 %2481, %v1425_v3   ;;  %1605 = vperm.xlu0 %2480, %v1426_v40  }
 0x2cb   : > { %1626 = vperm.xlu1 %2481, %v1433_v59   ;;  %1629 = vperm.xlu0 %2480, %v1434_v41  }
 0x2cf   : > { %1650 = vperm.xlu1 %2481, %v1441_v1   ;;  %1653 = vperm.xlu0 %2480, %v1442_v11  }
 0x2d3   : > { %1674 = vperm.xlu1 %2481, %v1449_v14   ;;  %1677 = vperm.xlu0 %2480, %v1450_v43  }
 0x2d7   : > { %1698 = vperm.xlu1 %2481, %v1457_v19   ;;  %1701 = vperm.xlu0 %2480, %v1458_v51  }
 0x2db   : > { %1608 = vperm.xlu1 %2481, %v1427_v12   ;;  %1632 = vperm.xlu0 %2480, %v1435_v23  }
 0x2df   : > { %1656 = vperm.xlu1 %2481, %v1443_v15   ;;  %1680 = vperm.xlu0 %2480, %v1451_v22  }
 0x2e3   : > { %1704 = vperm.xlu1 %2481, %v1459_v2   ;;  %1611 = vperm.xlu0 %2480, %v1428_v27  }
 0x2e7   : > { %1635 = vperm.xlu1 %2481, %v1436_v56   ;;  %1659 = vperm.xlu0 %2480, %v1444_v0  }
 0x2eb   : > { %1683 = vperm.xlu1 %2481, %v1452_v6   ;;  %1707 = vperm.xlu0 %2480, %v1460_v24  }
 0x2ef   : > { %1614 = vperm.xlu1 %2481, %v1429_v25   ;;  %1638 = vperm.xlu0 %2480, %v1437_v31  }
 0x2f3   : > { %1662 = vperm.xlu1 %2481, %v1445_v49   ;;  %1686 = vperm.xlu0 %2480, %v1453_v8  }
 0x2f7   : > { %1710 = vperm.xlu1 %2481, %v1461_v36   ;;  %1617 = vperm.xlu0 %2480, %v1430_v30  }
 0x2fb   : > { %1641 = vperm.xlu1 %2481, %v1438_v35   ;;  %1665 = vperm.xlu0 %2480, %v1446_v60  }
 0x2ff   : > { %1689 = vperm.xlu1 %2481, %v1454_v10   ;;  %1713 = vperm.xlu0 %2480, %v1462_v39  }
 0x303   : > { %1620 = vperm.xlu1 %2481, %v1431_v44   ;;  %1644 = vperm.xlu0 %2480, %v1439_v34  }
 0x307   : > { %1668 = vperm.xlu1 %2481, %v1447_v61   ;;  %1692 = vperm.xlu0 %2480, %v1455_v26  }
 0x30b   : > { %1716 = vperm.xlu1 %2481, %v1463_v28   ;;  %1623 = vperm.xlu0 %2480, %v1432_v32  }
 0x30f   : > { %1647 = vperm.xlu1 %2481, %v1440_v62   ;;  %1671 = vperm.xlu0 %2480, %v1448_v54  }
 0x313   : > { %1695 = vperm.xlu1 %2481, %v1456_v17   ;;  %1719 = vperm.xlu0 %2480, %v1464_v18  }
 0x316   : > { %v1531_v4 = vpop.permute.xlu1 %1530  ;;  %v1534_v45 = vpop.permute.xlu0 %1533 }
 0x317   : > { %2081 = vbcast.lane.b32.xlu1 %v3547_v5, 264  ;;  %2077 = vbcast.lane.b32.xlu0 %v3547_v5, 256  ;;  %v1724_v59 = vrot.slane %v1531_v4, %v3253_v37  ;;  %v1728_v41 = vrot.slane %v1534_v45, %v3253_v37 }
 0x319   : > { %v1977_v19 = vsel %vm850_vm7, %v1728_v41, %v1724_v59 }
 0x31a   : > { %v1537_v29 = vpop.permute.xlu1 %1536  ;;  %v1540_v53 = vpop.permute.xlu0 %1539 }
 0x31b   : > { %2085 = vbcast.lane.b32.xlu1 %v3547_v5, 272  ;;  %2089 = vbcast.lane.b32.xlu0 %v3547_v5, 280  ;;  %v1732_v11 = vrot.slane %v1537_v29, %v3253_v37  ;;  %v1736_v51 = vrot.slane %v1540_v53, %v3253_v37 }
 0x31d   : > { %v1978_v23 = vsel %vm852_vm8, %v1732_v11, %v1977_v19 }
 0x31e   : > { %v1543_v55 = vpop.permute.xlu1 %1542  ;;  %v1546_v38 = vpop.permute.xlu0 %1545  ;;  %v1979_v0 = vsel %vm854_vm9, %v1736_v51, %v1978_v23 }
 0x31f   : > { %2093 = vbcast.lane.b32.xlu1 %v3547_v5, 288  ;;  %2097 = vbcast.lane.b32.xlu0 %v3547_v5, 296  ;;  %v1740_v15 = vrot.slane %v1543_v55, %v3253_v37  ;;  %v1744_v24 = vrot.slane %v1546_v38, %v3253_v37 }
 0x321   : > { %v1981_v63 = vsel %vm1980_vm11, %v1740_v15, %v1979_v0 }
 0x322   : > { %v1549_v16 = vpop.permute.xlu1 %1548  ;;  %v1552_v46 = vpop.permute.xlu0 %1551  ;;  %v1983_v60 = vsel %vm1982_vm12, %v1744_v24, %v1981_v63 }
 0x323   : > { %v1748_v8 = vrot.slane %v1549_v16, %v3253_v37  ;;  %v1752_v9 = vrot.slane %v1552_v46, %v3253_v37 }
 0x325   : > { %v1985_v26 = vsel %vm1984_vm13, %v1748_v8, %v1983_v60 }
 0x326   : > { %v1555_v21 = vpop.permute.xlu1 %1554  ;;  %v1558_v7 = vpop.permute.xlu0 %1557  ;;  %v1987_v58 = vsel %vm1986_vm14, %v1752_v9, %v1985_v26 }
 0x327   : > { %v1756_v13 = vrot.slane %v1555_v21, %v3253_v37  ;;  %v1760_v3 = vrot.slane %v1558_v7, %v3253_v37  ;;  %v2046_v29 = vsel %vm2045_vm15, %v1987_v58, 0.0 }
 0x329   : > { %v1988_v52 = vsel %vm850_vm7, %v1760_v3, %v1756_v13 }
 0x32a   : > { %v1561_v42 = vpop.permute.xlu1 %1560  ;;  %v1564_v40 = vpop.permute.xlu0 %1563 }
 0x32b   : > { %v1764_v33 = vrot.slane %v1561_v42, %v3253_v37  ;;  %v1768_v14 = vrot.slane %v1564_v40, %v3253_v37 }
 0x32d   : > { %v1989_v50 = vsel %vm852_vm8, %v1764_v33, %v1988_v52 }
 0x32e   : > { %v1567_v1 = vpop.permute.xlu1 %1566  ;;  %v1570_v43 = vpop.permute.xlu0 %1569  ;;  %v1990_v22 = vsel %vm854_vm9, %v1768_v14, %v1989_v50 }
 0x32f   : > { %v1772_v47 = vrot.slane %v1567_v1, %v3253_v37  ;;  %v1776_v57 = vrot.slane %v1570_v43, %v3253_v37 }
 0x331   : > { %v1991_v27 = vsel %vm1980_vm11, %v1772_v47, %v1990_v22 }
 0x332   : > { %v1573_v12 = vpop.permute.xlu1 %1572  ;;  %v1576_v2 = vpop.permute.xlu0 %1575  ;;  %v1992_v25 = vsel %vm1982_vm12, %v1776_v57, %v1991_v27 }
 0x333   : > { %v1780_v56 = vrot.slane %v1573_v12, %v3253_v37  ;;  %v1784_v31 = vrot.slane %v1576_v2, %v3253_v37 }
 0x335   : > { %v1993_v30 = vsel %vm1984_vm13, %v1780_v56, %v1992_v25 }
 0x336   : > { %v1579_v6 = vpop.permute.xlu1 %1578  ;;  %v1582_v49 = vpop.permute.xlu0 %1581  ;;  %v1994_v44 = vsel %vm1986_vm14, %v1784_v31, %v1993_v30 }
 0x337   : > { %v1788_v48 = vrot.slane %v1579_v6, %v3253_v37  ;;  %v1792_v36 = vrot.slane %v1582_v49, %v3253_v37  ;;  %v2049_v32 = vsel %vm2045_vm15, %v1994_v44, 0.0 }
 0x339   : > { %v1995_v34 = vsel %vm850_vm7, %v1792_v36, %v1788_v48 }
 0x33a   : > { %v1585_v35 = vpop.permute.xlu1 %1584  ;;  %v1588_v39 = vpop.permute.xlu0 %1587 }
 0x33b   : > { %v1796_v10 = vrot.slane %v1585_v35, %v3253_v37  ;;  %v1800_v61 = vrot.slane %v1588_v39, %v3253_v37 }
 0x33d   : > { %v1996_v20 = vsel %vm852_vm8, %v1796_v10, %v1995_v34 }
 0x33e   : > { %v1591_v28 = vpop.permute.xlu1 %1590  ;;  %2050 = vadd.xlane.f32.xlu0 %v2049_v32  ;;  %v1594_v54 = vpop.permute.xlu0 %1593  ;;  %v1997_v17 = vsel %vm854_vm9, %v1800_v61, %v1996_v20 }
 0x33f   : > { %v1804_v62 = vrot.slane %v1591_v28, %v3253_v37  ;;  %v1808_v18 = vrot.slane %v1594_v54, %v3253_v37 }
 0x341   : > { %v1998_v4 = vsel %vm1980_vm11, %v1804_v62, %v1997_v17 }
 0x342   : > { %v1597_v45 = vpop.permute.xlu1 %1596  ;;  %v1600_v55 = vpop.permute.xlu0 %1599  ;;  %v1999_v38 = vsel %vm1982_vm12, %v1808_v18, %v1998_v4 }
 0x343   : > { %v1812_v53 = vrot.slane %v1597_v45, %v3253_v37  ;;  %2047 = vadd.xlane.f32.xlu1 %v2046_v29  ;;  %v1816_v16 = vrot.slane %v1600_v55, %v3253_v37 }
 0x345   : > { %v2000_v46 = vsel %vm1984_vm13, %v1812_v53, %v1999_v38 }
 0x346   : > { %v1603_v21 = vpop.permute.xlu1 %1602  ;;  %v2001_v7 = vsel %vm1986_vm14, %v1816_v16, %v2000_v46  ;;  %v1606_v42 = vpop.permute.xlu0 %1605 }
 0x347   : > { %v2052_v13 = vsel %vm2045_vm15, %v2001_v7, 0.0  ;;  %v1820_v49 = vrot.slane %v1603_v21, %v3253_v37  ;;  %v1824_v8 = vrot.slane %v1606_v42, %v3253_v37 }
 0x348   : > { %2053 = vadd.xlane.f32.xlu0 %v2052_v13 }
 0x349   : > { %v2002_v28 = vsel %vm850_vm7, %v1824_v8, %v1820_v49 }
 0x34a   : > { %v1627_v3 = vpop.permute.xlu1 %1626  ;;  %v1630_v40 = vpop.permute.xlu0 %1629 }
 0x34b   : > { %v1852_v48 = vrot.slane %v1627_v3, %v3253_v37  ;;  %v1856_v36 = vrot.slane %v1630_v40, %v3253_v37 }
 0x34d   : > { %v2009_v54 = vsel %vm850_vm7, %v1856_v36, %v1852_v48 }
 0x34e   : > { %v1651_v33 = vpop.permute.xlu1 %1650  ;;  %v1654_v59 = vpop.permute.xlu0 %1653 }
 0x34f   : > { %v1884_v30 = vrot.slane %v1651_v33, %v3253_v37  ;;  %v1888_v35 = vrot.slane %v1654_v59, %v3253_v37 }
 0x351   : > { %v2016_v58 = vsel %vm850_vm7, %v1888_v35, %v1884_v30 }
 0x352   : > { %v1675_v41 = vpop.permute.xlu1 %1674  ;;  %v1678_v1 = vpop.permute.xlu0 %1677 }
 0x353   : > { %v1916_v9 = vrot.slane %v1675_v41, %v3253_v37  ;;  %v1920_v10 = vrot.slane %v1678_v1, %v3253_v37 }
 0x355   : > { %v2023_v45 = vsel %vm850_vm7, %v1920_v10, %v1916_v9 }
 0x356   : > { %v1699_v11 = vpop.permute.xlu1 %1698  ;;  %v1702_v52 = vpop.permute.xlu0 %1701 }
 0x357   : > { %v1948_v39 = vrot.slane %v1699_v11, %v3253_v37  ;;  %v1952_v44 = vrot.slane %v1702_v52, %v3253_v37 }
 0x359   : > { %v2030_v29 = vsel %vm850_vm7, %v1952_v44, %v1948_v39 }
 0x35a   : > { %v1609_v14 = vpop.permute.xlu1 %1608  ;;  %v1633_v43 = vpop.permute.xlu0 %1632 }
 0x35b   : > { %v1828_v61 = vrot.slane %v1609_v14, %v3253_v37  ;;  %v1860_v26 = vrot.slane %v1633_v43, %v3253_v37 }
 0x35d   : > { %v2003_v16 = vsel %vm852_vm8, %v1828_v61, %v2002_v28  ;;  %v2010_v46 = vsel %vm852_vm8, %v1860_v26, %v2009_v54 }
 0x35e   : > { %v1657_v50 = vpop.permute.xlu1 %1656  ;;  %v1681_v47 = vpop.permute.xlu0 %1680 }
 0x35f   : > { %v1892_v20 = vrot.slane %v1657_v50, %v3253_v37  ;;  %v1924_v32 = vrot.slane %v1681_v47, %v3253_v37 }
 0x361   : > { %v2017_v21 = vsel %vm852_vm8, %v1892_v20, %v2016_v58  ;;  %v2024_v42 = vsel %vm852_vm8, %v1924_v32, %v2023_v45 }
 0x362   : > { %v1705_v19 = vpop.permute.xlu1 %1704  ;;  %v1612_v51 = vpop.permute.xlu0 %1611 }
 0x363   : > { %v1956_v62 = vrot.slane %v1705_v19, %v3253_v37  ;;  %v1832_v17 = vrot.slane %v1612_v51, %v3253_v37 }
 0x365   : > { %v2031_v13 = vsel %vm852_vm8, %v1956_v62, %v2030_v29  ;;  %v2004_v33 = vsel %vm854_vm9, %v1832_v17, %v2003_v16 }
 0x366   : > { %v1636_v12 = vpop.permute.xlu1 %1635  ;;  %v1660_v23 = vpop.permute.xlu0 %1659 }
 0x367   : > { %v1864_v18 = vrot.slane %v1636_v12, %v3253_v37  ;;  %v1896_v53 = vrot.slane %v1660_v23, %v3253_v37 }
 0x369   : > { %v2011_v59 = vsel %vm854_vm9, %v1864_v18, %v2010_v46  ;;  %v2018_v52 = vsel %vm854_vm9, %v1896_v53, %v2017_v21 }
 0x36a   : > { %v3603_v15 = vpop.permute.xlu1 %1683  ;;  %v3605_v22 = vpop.permute.xlu0 %1707 }
 0x36b   : > { %v1928_v14 = vrot.slane %v3603_v15, %v3253_v37  ;;  %v1960_v19 = vrot.slane %v3605_v22, %v3253_v37 }
 0x36d   : > { %v2025_v10 = vsel %vm854_vm9, %v1928_v14, %v2024_v42 }
 0x36e   : > { %v1615_v57 = vpop.permute.xlu1 %1614  ;;  %v1639_v2 = vpop.permute.xlu0 %1638 }
 0x36f   : > { %v1836_v55 = vrot.slane %v1615_v57, %v3253_v37  ;;  %v1868_v3 = vrot.slane %v1639_v2, %v3253_v37 }
 0x371   : > { %v2005_v43 = vsel %vm1980_vm11, %v1836_v55, %v2004_v33  ;;  %v2012_v57 = vsel %vm1980_vm11, %v1868_v3, %v2011_v59 }
 0x372   : > { %v3607_v27 = vpop.permute.xlu1 %1662  ;;  %v3609_v56 = vpop.permute.xlu0 %1686 }
 0x373   : > { %v1900_v41 = vrot.slane %v3607_v27, %v3253_v37  ;;  %v1932_v15 = vrot.slane %v3609_v56, %v3253_v37 }
 0x375   : > { %v2026_v61 = vsel %vm1980_vm11, %v1932_v15, %v2025_v10 }
 0x376   : > { %v3611_v0 = vpop.permute.xlu1 %1710  ;;  %v1618_v6 = vpop.permute.xlu0 %1617 }
 0x377   : > { %v1840_v7 = vrot.slane %v1618_v6, %v3253_v37  ;;  %v2019_v6 = vsel %vm1980_vm11, %v1900_v41, %v2018_v52  ;;  %v1964_v22 = vrot.slane %v3611_v0, %v3253_v37 }
 0x379   : > { %v2006_v51 = vsel %vm1982_vm12, %v1840_v7, %v2005_v43 }
 0x37a   : > { %v1642_v63 = vpop.permute.xlu1 %1641  ;;  %v3613_v24 = vpop.permute.xlu0 %1665 }
 0x37b   : > { %v1872_v1 = vrot.slane %v1642_v63, %v3253_v37  ;;  %v1904_v50 = vrot.slane %v3613_v24, %v3253_v37 }
 0x37d   : > { %v2013_v63 = vsel %vm1982_vm12, %v1872_v1, %v2012_v57  ;;  %v2020_v8 = vsel %vm1982_vm12, %v1904_v50, %v2019_v6 }
 0x37e   : > { %v3615_v25 = vpop.permute.xlu1 %1689  ;;  %v3617_v31 = vpop.permute.xlu0 %1713 }
 0x37f   : > { %v1936_v48 = vrot.slane %v3615_v25, %v3253_v37  ;;  %v1968_v35 = vrot.slane %v3617_v31, %v3253_v37 }
 0x381   : > { %v2027_v32 = vsel %vm1982_vm12, %v1936_v48, %v2026_v61 }
 0x382   : > { %v1621_v60 = vpop.permute.xlu1 %1620  ;;  %v1645_v34 = vpop.permute.xlu0 %1644 }
 0x383   : > { %v1844_v40 = vrot.slane %v1621_v60, %v3253_v37  ;;  %v1876_v12 = vrot.slane %v1645_v34, %v3253_v37  ;;  %v2032_v34 = vsel %vm854_vm9, %v1960_v19, %v2031_v13 }
 0x384   : > { %v2033_v28 = vsel %vm1980_vm11, %v1964_v22, %v2032_v34 }
 0x385   : > { %v2007_v27 = vsel %vm1984_vm13, %v1844_v40, %v2006_v51  ;;  %v2014_v9 = vsel %vm1984_vm13, %v1876_v12, %v2013_v63  ;;  %v2034_v17 = vsel %vm1982_vm12, %v1968_v35, %v2033_v28 }
 0x386   : > { %v1669_v4 = vpop.permute.xlu1 %1668  ;;  %v1693_v38 = vpop.permute.xlu0 %1692 }
 0x387   : > { %v1908_v2 = vrot.slane %v1669_v4, %v3253_v37  ;;  %v1940_v0 = vrot.slane %v1693_v38, %v3253_v37 }
 0x389   : > { %v2021_v44 = vsel %vm1984_vm13, %v1908_v2, %v2020_v8  ;;  %v2028_v4 = vsel %vm1984_vm13, %v1940_v0, %v2027_v32 }
 0x38a   : > { %v1717_v11 = vpop.permute.xlu1 %1716  ;;  %v1624_v47 = vpop.permute.xlu0 %1623 }
 0x38b   : > { %v1848_v23 = vrot.slane %v1624_v47, %v3253_v37  ;;  %v1972_v39 = vrot.slane %v1717_v11, %v3253_v37 }
 0x38d   : > { %v2008_v49 = vsel %vm1986_vm14, %v1848_v23, %v2007_v27  ;;  %v2035_v29 = vsel %vm1984_vm13, %v1972_v39, %v2034_v17 }
 0x38e   : > { %v1648_v24 = vpop.permute.xlu1 %1647  ;;  %v1672_v36 = vpop.permute.xlu0 %1671  ;;  %v2055_v30 = vsel %vm2045_vm15, %v2008_v49, 0.0 }
 0x38f   : > { %v1880_v56 = vrot.slane %v1648_v24, %v3253_v37  ;;  %v1912_v60 = vrot.slane %v1672_v36, %v3253_v37  ;;  %2056 = vadd.xlane.f32.xlu1 %v2055_v30 }
 0x391   : > { %v2015_v25 = vsel %vm1986_vm14, %v1880_v56, %v2014_v9  ;;  %v2022_v20 = vsel %vm1986_vm14, %v1912_v60, %v2021_v44 }
 0x392   : > { %v1696_v31 = vpop.permute.xlu1 %1695  ;;  %v2058_v26 = vsel %vm2045_vm15, %v2015_v25, 0.0  ;;  %v1720_v54 = vpop.permute.xlu0 %1719  ;;  %v2061_v58 = vsel %vm2045_vm15, %v2022_v20, 0.0 }
 0x393   : > { %v1944_v62 = vrot.slane %v1696_v31, %v3253_v37  ;;  %2059 = vadd.xlane.f32.xlu0 %v2058_v26  ;;  %v1976_v18 = vrot.slane %v1720_v54, %v3253_v37  ;;  %2062 = vadd.xlane.f32.xlu1 %v2061_v58 }
 0x395   : > { %v2029_v45 = vsel %vm1986_vm14, %v1944_v62, %v2028_v4  ;;  %v2036_v55 = vsel %vm1986_vm14, %v1976_v18, %v2035_v29 }
 0x396   : > { %v2064_v53 = vsel %vm2045_vm15, %v2029_v45, 0.0  ;;  %v2067_v38 = vsel %vm2045_vm15, %v2036_v55, 0.0  ;;  %v2078_v37 = vpop.permute.xlu0 %2077  ;;  %v2082_v16 = vpop.permute.xlu1 %2081 }
 0x397   : > { %2065 = vadd.xlane.f32.xlu0 %v2064_v53  ;;  %2068 = vadd.xlane.f32.xlu1 %v2067_v38 }
 0x39a   : > { %v2090_v46 = vpop.permute.xlu0 %2089  ;;  %v2086_v21 = vpop.permute.xlu1 %2085 }
 0x39e   : > { %v2098_v7 = vpop.permute.xlu0 %2097  ;;  %v2094_v42 = vpop.permute.xlu1 %2093 }
 0x3a8   : > { %2101 = vbcast.lane.b32.xlu1 %v3547_v5, 304 }
 0x3ad   : > { %2105 = vbcast.lane.b32.xlu0 %v3547_v5, 312 }
 0x3cb   : > { %v2051_v13 = vpop.xlane.xlu0 %2050 }
 0x3cc   : > { %v2116_v3 = vadd.f32 %v2082_v16, %v2051_v13  ;;  %v2514_v16 = vld [vmem:[%s3001_s17 + $0x10] sm:$0xff]  ;;  %v2516_v13 = vld [vmem:[%s3001_s17] sm:$0xff] }
 0x3ce   : > { %v2124_v40 = vsub.f32 0.0, %v2116_v3 }
 0x3d0   : > { %v2048_v33 = vpop.xlane.xlu1 %2047  ;;  %v2133_v59 = vmul.f32 1.442695, %v2124_v40  ;;  %v2517_v40 = vld [vmem:[%s3001_s17 + $0x8] sm:$0xff] }
 0x3d1   : > { %v2115_v41 = vadd.f32 %v2078_v37, %v2048_v33 }
 0x3d2   : > { %2482 = vpow2.f32 %v2133_v59 }
 0x3d3   : > { %v2123_v1 = vsub.f32 0.0, %v2115_v41  ;;  %v2518_v41 = vld [vmem:[%s3001_s17 + $0x20] sm:$0xff] }
 0x3d5   : > { %v2131_v11 = vmul.f32 1.442695, %v2123_v1  ;;  %v2054_v52 = vpop.xlane.xlu0 %2053 }
 0x3d6   : > { %v2117_v14 = vadd.f32 %v2086_v21, %v2054_v52  ;;  %v2515_v21 = vld [vmem:[%s3001_s17 + $0x18] sm:$0xff] }
 0x3d7   : > { %2484 = vpow2.f32 %v2131_v11  ;;  %v2519_v11 = vld [vmem:[%s3001_s17 + $0x28] sm:$0xff] }
 0x3d8   : > { %v2125_v43 = vsub.f32 0.0, %v2117_v14 }
 0x3da   : > { %v2135_v5 = vmul.f32 1.442695, %v2125_v43  ;;  %v2520_v43 = vld [vmem:[%s3001_s17 + $0x30] sm:$0xff] }
 0x3dc   : > { %2486 = vpow2.f32 %v2135_v5  ;;  %v2483_v50 = vpop.eup %2482 }
 0x3dd   : > { %v2148_v47 = vadd.f32 1.0, %v2483_v50  ;;  %v2521_v50 = vld [vmem:[%s3001_s17 + $0x38] sm:$0xff] }
 0x3df   : > { %2488 = vrcp.f32 %v2148_v47 }
 0x3e1   : > { %v2485_v19 = vpop.eup %2484 }
 0x3e2   : > { %v2147_v51 = vadd.f32 1.0, %v2485_v19 }
 0x3e4   : > { %2490 = vrcp.f32 %v2147_v51  ;;  %v2522_v51 = vld [vmem:[%s3001_s17 + $0x40] sm:$0xff] }
 0x3e6   : > { %v2487_v12 = vpop.eup %2486 }
 0x3e7   : > { %v2149_v23 = vadd.f32 1.0, %v2487_v12 }
 0x3e9   : > { %2492 = vrcp.f32 %v2149_v23  ;;  %v2489_v57 = vpop.eup %2488  ;;  %v2523_v23 = vld [vmem:[%s3001_s17 + $0x48] sm:$0xff] }
 0x3ea   : > { %2170 = vperm.xlu0 %2480, %v2489_v57  }
 0x3ee   : > { %v2491_v15 = vpop.eup %2490 }
 0x3ef   : > { %2165 = vperm.xlu1 %2481, %v2491_v15  }
 0x3f3   : > { %v2493_v2 = vpop.eup %2492 }
 0x3f4   : > { %2175 = vperm.xlu1 %2481, %v2493_v2   ;;  %v2524_v2 = vld [vmem:[%s3001_s17 + $0x50] sm:$0xff] }
 0x41c   : > { %v2057_v27 = vpop.xlane.xlu1 %2056 }
 0x41d   : > { %v2118_v6 = vadd.f32 %v2090_v46, %v2057_v27 }
 0x41f   : > { %v2126_v22 = vsub.f32 0.0, %v2118_v6  ;;  %v2525_v6 = vld [vmem:[%s3001_s17 + $0x58] sm:$0xff] }
 0x420   : > { %v2060_v63 = vpop.xlane.xlu0 %2059  ;;  %v2063_v24 = vpop.xlane.xlu1 %2062 }
 0x421   : > { %v2119_v49 = vadd.f32 %v2094_v42, %v2060_v63  ;;  %v2137_v8 = vmul.f32 1.442695, %v2126_v22  ;;  %v2120_v48 = vadd.f32 %v2098_v7, %v2063_v24 }
 0x423   : > { %v2127_v56 = vsub.f32 0.0, %v2119_v49  ;;  %2494 = vpow2.f32 %v2137_v8  ;;  %v2128_v36 = vsub.f32 0.0, %v2120_v48  ;;  %v2526_v49 = vld [vmem:[%s3001_s17 + $0x70] sm:$0xff]  ;;  %v2527_v48 = vld [vmem:[%s3001_s17 + $0x78] sm:$0xff] }
 0x424   : > { %v2066_v30 = vpop.xlane.xlu0 %2065  ;;  %v2069_v0 = vpop.xlane.xlu1 %2068 }
 0x425   : > { %v2139_v35 = vmul.f32 1.442695, %v2127_v56  ;;  %v2141_v60 = vmul.f32 1.442695, %v2128_v36  ;;  %v2528_v36 = vld [vmem:[%s3001_s17 + $0x60] sm:$0xff] }
 0x427   : > { %2496 = vpow2.f32 %v2139_v35  ;;  %v2529_v35 = vld [vmem:[%s3001_s17 + $0x68] sm:$0xff] }
 0x428   : > { %2498 = vpow2.f32 %v2141_v60  ;;  %v2106_v9 = vpop.permute.xlu0 %2105  ;;  %v2102_v10 = vpop.permute.xlu1 %2101 }
 0x429   : > { %v2122_v39 = vadd.f32 %v2106_v9, %v2069_v0  ;;  %v2121_v25 = vadd.f32 %v2102_v10, %v2066_v30 }
 0x42b   : > { %v2130_v44 = vsub.f32 0.0, %v2122_v39  ;;  %v2129_v34 = vsub.f32 0.0, %v2121_v25 }
 0x42d   : > { %v2145_v61 = vmul.f32 1.442695, %v2130_v44  ;;  %v2495_v31 = vpop.eup %2494  ;;  %v2143_v26 = vmul.f32 1.442695, %v2129_v34 }
 0x42e   : > { %v2150_v20 = vadd.f32 1.0, %v2495_v31 }
 0x42f   : > { %2500 = vpow2.f32 %v2145_v61 }
 0x430   : > { %2502 = vpow2.f32 %v2143_v26 }
 0x431   : > { %v2497_v28 = vpop.eup %2496  ;;  %2504 = vrcp.f32 %v2150_v20 }
 0x432   : > { %v2499_v32 = vpop.eup %2498  ;;  %v2151_v62 = vadd.f32 1.0, %v2497_v28 }
 0x433   : > { %v2152_v54 = vadd.f32 1.0, %v2499_v32 }
 0x434   : > { %2506 = vrcp.f32 %v2151_v62 }
 0x435   : > { %2508 = vrcp.f32 %v2152_v54 }
 0x439   : > { %v2501_v58 = vpop.eup %2500 }
 0x43a   : > { %v2503_v17 = vpop.eup %2502  ;;  %v2154_v18 = vadd.f32 1.0, %v2501_v58 }
 0x43b   : > { %v2505_v4 = vpop.eup %2504  ;;  %v2153_v45 = vadd.f32 1.0, %v2503_v17 }
 0x43c   : > { %2510 = vrcp.f32 %v2154_v18  ;;  %2180 = vperm.xlu0 %2480, %v2505_v4  }
 0x43d   : > { %2512 = vrcp.f32 %v2153_v45 }
 0x43e   : > { %v2507_v29 = vpop.eup %2506 }
 0x43f   : > { %v2509_v53 = vpop.eup %2508  ;;  %2185 = vperm.xlu1 %2481, %v2507_v29  }
 0x440   : > { %2190 = vperm.xlu0 %2480, %v2509_v53  }
 0x446   : > { %v2511_v55 = vpop.eup %2510 }
 0x447   : > { %v2513_v38 = vpop.eup %2512  ;;  %2200 = vperm.xlu0 %2480, %v2511_v55  }
 0x448   : > { %2195 = vperm.xlu1 %2481, %v2513_v38  }
 0x469   : > { %v2171_v37 = vpop.permute.xlu0 %2170 }
 0x46a   : > { %v2205_v46 = vmul.f32 %v2514_v16, %v2171_v37  ;;  %v2206_v7 = vmul.f32 %v2515_v21, %v2171_v37 }
 0x46c   : > { %2221 = vst [vmem:[%s3713_s24 + $0x10] sm:$0xff] %v2205_v46  ;;  %2222 = vst [vmem:[%s3713_s24 + $0x18] sm:$0xff] %v2206_v7 }
 0x46e   : > { %v2166_v42 = vpop.permute.xlu1 %2165 }
 0x46f   : > { %v2203_v3 = vmul.f32 %v2516_v13, %v2166_v42  ;;  %v2204_v33 = vmul.f32 %v2517_v40, %v2166_v42 }
 0x471   : > { %2219 = vst [vmem:[%s3713_s24] sm:$0xff] %v2203_v3  ;;  %2220 = vst [vmem:[%s3713_s24 + $0x8] sm:$0xff] %v2204_v33 }
 0x473   : > { %v2176_v59 = vpop.permute.xlu1 %2175 }
 0x474   : > { %v2207_v1 = vmul.f32 %v2518_v41, %v2176_v59  ;;  %v2208_v52 = vmul.f32 %v2519_v11, %v2176_v59 }
 0x476   : > { %2223 = vst [vmem:[%s3713_s24 + $0x20] sm:$0xff] %v2207_v1  ;;  %2224 = vst [vmem:[%s3713_s24 + $0x28] sm:$0xff] %v2208_v52 }
 0x4bb   : > { %v2181_v14 = vpop.permute.xlu0 %2180 }
 0x4bc   : > { %v2209_v5 = vmul.f32 %v2520_v43, %v2181_v14  ;;  %v2210_v47 = vmul.f32 %v2521_v50, %v2181_v14 }
 0x4be   : > { %2225 = vst [vmem:[%s3713_s24 + $0x30] sm:$0xff] %v2209_v5  ;;  %2226 = vst [vmem:[%s3713_s24 + $0x38] sm:$0xff] %v2210_v47  ;;  %v2186_v19 = vpop.permute.xlu1 %2185 }
 0x4bf   : > { %v2211_v12 = vmul.f32 %v2522_v51, %v2186_v19  ;;  %v2212_v57 = vmul.f32 %v2523_v23, %v2186_v19  ;;  %v2191_v15 = vpop.permute.xlu0 %2190 }
 0x4c0   : > { %v2213_v27 = vmul.f32 %v2524_v2, %v2191_v15  ;;  %v2214_v22 = vmul.f32 %v2525_v6, %v2191_v15 }
 0x4c1   : > { %2227 = vst [vmem:[%s3713_s24 + $0x40] sm:$0xff] %v2211_v12  ;;  %2228 = vst [vmem:[%s3713_s24 + $0x48] sm:$0xff] %v2212_v57 }
 0x4c2   : > { %2229 = vst [vmem:[%s3713_s24 + $0x50] sm:$0xff] %v2213_v27  ;;  %2230 = vst [vmem:[%s3713_s24 + $0x58] sm:$0xff] %v2214_v22 }
 0x4c6   : > { %v2201_v63 = vpop.permute.xlu0 %2200 }
 0x4c7   : > { %v2196_v24 = vpop.permute.xlu1 %2195  ;;  %v2217_v8 = vmul.f32 %v2526_v49, %v2201_v63  ;;  %v2218_v56 = vmul.f32 %v2527_v48, %v2201_v63 }
 0x4c8   : > { %v2215_v30 = vmul.f32 %v2528_v36, %v2196_v24  ;;  %v2216_v0 = vmul.f32 %v2529_v35, %v2196_v24 }
 0x4c9   : > { %2233 = vst [vmem:[%s3713_s24 + $0x70] sm:$0xff] %v2217_v8  ;;  %2234 = vst [vmem:[%s3713_s24 + $0x78] sm:$0xff] %v2218_v56 }
 0x4ca   : > { %2231 = vst [vmem:[%s3713_s24 + $0x60] sm:$0xff] %v2215_v30  ;;  %2232 = vst [vmem:[%s3713_s24 + $0x68] sm:$0xff] %v2216_v0 }
 0x4cb   : > { %2685 = shalt.err (!%p2682_p13)
}
 0x4cc   : > { %s2686_s13 = scalar_lea.hbm %s3744_s12, 2048  ;;  %s2690_s27 = scalar_lea.hbm %s3801_s5, 4096 }
 0x4cd   : > { %p2687_p0 = scmp.ne.s32.totalorder %s3744_s12, %s2686_s13  ;;  %p2691_p9 = scmp.lt.u32.totalorder %s3744_s12, %s3801_s5 }
 0x4ce   : > { %p2692_p12 = scmp.lt.u32.totalorder %s2690_s27, %s2686_s13  ;;  %p2694_p4 = scmp.lt.u32.totalorder %s2686_s13, %s3744_s12 }
 0x4cf   : > { %p2688_p5 = pnand %p2687_p0, %p2943_p1 }
 0x4d0   : > { %p2693_p2 = por %p2692_p12, %p2691_p9 }
 0x4d1   : > { %p2689_p11 = pneg %p2688_p5 }
 0x4d2   : > { %p2695_p6 = por %p2694_p4, %p2693_p2 }
 0x4d4   : > { %p2696_p8 = pnand %p2695_p6, %p2689_p11 }
 0x4d6   : > { %2699 = shalt.err (!%p2696_p8)
}
 0x4d7   : > { %s2759_s26 = smov 256   ;;  %s2760_s11 = smov 16  }
 0x4d8   : > { %2404 = dma.vmem_to_hbm [thread:$0]  (%p2943_p1), %s3746_s9, 2048, %s3744_s12, %s2236_s22, %s2759_s26, %s2759_s26, %s2760_s11  }
 0x4d9 PF: > { %s2264_s8 = sand.u32 1, %s2734_s18   ;;  %p3819_p3 = scmp.ne.s32.totalorder %s3806_s25, 0 }
 0x4da   : > { %p3820_p7 = scmp.ge.s32.totalorder %s2746_s21, 2  ;;  %s2265_s23 = scalar_lea.sflag [#allocation4], %s2264_s8 }
 0x4dc   : > { %p2424_p10 = pnand %p3820_p7, %p3819_p3 }
 0x4de   : > { %2729 = dma.done.wait (!%p2424_p10), %s2265_s23, 2048  }
 0x4df   : > { %2731 = vsyncadd (!%p2424_p10), %s2265_s23, 4294965248  ;;  %p20_p13 = scmp.ge.s32.totalorder %s2933_s14, 4   ;;  %s3821_s18 = smov %s2738_s19 }
 0x4e0   : > { %s3822_s19 = smov %s2742_s20  ;;  %s3823_s20 = smov %s2949_s16 }
 0x4e1   : > { %s3824_s21 = smov %s2933_s14  ;;  %22 = sbr.rel (!%p20_p13) target bundleno = 7 (0x7), region = 101 }
 0x4e8   :  { %2270 = vsyncpa [#allocation3], 1 }
 0x4e9   :  { %2272 = vsyncpa [#allocation3 + $0x1], 1 }
 0x4ea   :  { %2273 = vsyncpa [#allocation6], 1 }
 0x4eb   :  { %2274 = vsyncpa [#allocation9], 1 }
 0x4ec   :  { %2275 = vsyncpa [#allocation4], 1 }
 0x4ed   :  { %2277 = vsyncpa [#allocation4 + $0x1], 1 }

</bundles_post_ra>
